<compile_context>
chip_gen: v7x
topology: tpu7x:2x2x1
jax: 0.10.0
libtpu: 0.0.40
codegen_flags: <defaults>
</compile_context>

<pallas_src>
import functools

import jax
import jax.numpy as jnp
from jax import lax
from jax.experimental import pallas as pl
from jax.experimental.pallas import tpu as pltpu

LANE = 128
SUBLANE = 8


def _round_up(x, m):
    return ((x + m - 1) // m) * m


def _pad2d(a, rows, cols):
    r, c = a.shape
    return jnp.pad(a, ((0, rows - r), (0, cols - c)))


# --------------------------- prep kernel (param-only) ---------------------------
def _prep_kernel(*refs, layer_cfg):
    """Local RBF kernel w_hat, effective weights W_eff = W*w_hat, summed reg.

    One invocation, no grid.  refs = ([W, u, v] * nl, [W_eff] * nl, reg)
    layer_cfg[l] = (n_in, n_hid, lambda_s, lambda_2)
    """
    nl = len(layer_cfg)
    param_refs = refs[:3 * nl]
    weff_refs = refs[3 * nl:4 * nl]
    reg_ref = refs[4 * nl]

    total_reg = jnp.float32(0.0)
    for l, (n_in, n_hid, lam_s, lam_2) in enumerate(layer_cfg):
        W = param_refs[3 * l][...]      # (n_in_p, n_hid_p), zero padded
        u = param_refs[3 * l + 1][...]  # (n_in_p, n_dim_p), zero padded
        v = param_refs[3 * l + 2][...]  # (n_hid_p, n_dim_p), zero padded
        # ||u_i - v_j||^2 = |u_i|^2 + |v_j|^2 - 2 u_i.v_j
        # Cross term on the MXU contracting the LAST axes of u and v (no in-kernel
        # transpose of v); the |v_j|^2 row comes from a ones-row matmul so it is
        # already lane-dense (no (N,1)->(1,N) relayout).
        u2 = jnp.sum(u * u, axis=1, keepdims=True)                        # (n_in_p, 1)
        ones_row = jnp.ones((1, v.shape[1]), jnp.float32)
        v2 = lax.dot_general(ones_row, v * v, (((1,), (1,)), ((), ())),
                             preferred_element_type=jnp.float32)          # (1, n_hid_p)
        uv = lax.dot_general(u, v, (((1,), (1,)), ((), ())),
                             preferred_element_type=jnp.float32)          # (n_in_p, n_hid_p)
        w_hat = jnp.maximum(1.0 - (u2 + v2 - 2.0 * uv), 0.0)
        # CORRECTNESS NOTE: padded u/v rows are zero, so w_hat evaluates to 1 in the
        # padded region.  Mask it so (a) the reg mean only sees the true n_in x n_hid
        # extent and (b) W_eff is exactly zero there — the main kernel relies on that
        # so padded sigmoid(0)=0.5 activations never contribute to the next layer.
        if (w_hat.shape[0] != n_in) or (w_hat.shape[1] != n_hid):
            row_ok = lax.broadcasted_iota(jnp.int32, w_hat.shape, 0) < n_in
            col_ok = lax.broadcasted_iota(jnp.int32, w_hat.shape, 1) < n_hid
            w_hat = jnp.where(jnp.logical_and(row_ok, col_ok), w_hat, 0.0)
        cnt = float(n_in * n_hid)  # divide by TRUE element count, not padded
        total_reg = total_reg + lam_s * (jnp.sum(w_hat * w_hat) / cnt) \
                              + lam_2 * (jnp.sum(W * W) / cnt)
        weff_refs[l][...] = (W * w_hat).astype(weff_refs[l].dtype)
    reg_ref[0, 0] = total_reg  # scalar write-back on the SMEM/scalar path


# --------------------------- main kernel (M-tiled) ---------------------------
def _forward_kernel(*refs, apply_sigmoid, matmul_dtype):
    """Per-M-tile work: chained (matmul + bias + activation) over all layers.

    refs = (x, [W_eff, b] * nl, y).  W_eff/b are whole arrays resident in VMEM
    (single-buffered, constant across the M grid); intermediate activations
    never leave VMEM (no per-layer HBM roundtrip).
    """
    nl = len(apply_sigmoid)
    x_ref = refs[0]
    y_ref = refs[1 + 2 * nl]
    h = x_ref[...]
    for l in range(nl):
        w = refs[1 + 2 * l][...]   # (n_in_p, n_hid_p), matmul_dtype (bf16)
        b = refs[2 + 2 * l][...]   # (1, n_hid_p), f32
        # bf16 operands feed the MXU at its peak rate; accumulate in f32.
        # Bias add + sigmoid stay f32 (v5e has no bf16 VPU/EUP).
        h = jnp.dot(h.astype(matmul_dtype), w,
                    preferred_element_type=jnp.float32) + b
        if apply_sigmoid[l]:
            h = jax.nn.sigmoid(h)
        # TODO(synk): nn.Dropout(0.33) between layers is identity in eval mode;
        # training-mode stochastic dropout not reproduced here.
    y_ref[...] = h.astype(y_ref.dtype)


# --------------------------- wrappers ---------------------------
def prepare_kernel_net(params, matmul_dtype=jnp.bfloat16):
    """Pad/cast parameters once; cache the result across forward calls."""
    layers = []
    for p in params:
        n_in, n_hid = p["W"].shape
        n_dim = p["u"].shape[1]
        n_in_p = _round_up(n_in, LANE)
        n_hid_p = _round_up(n_hid, LANE)
        n_dim_p = _round_up(n_dim, LANE)
        layers.append(dict(
            n_in=n_in, n_hid=n_hid,
            n_in_p=n_in_p, n_hid_p=n_hid_p, n_dim_p=n_dim_p,
            lambda_s=float(p["lambda_s"]), lambda_2=float(p["lambda_2"]),
            apply_sigmoid=bool(p["apply_sigmoid"]),
            W=_pad2d(p["W"].astype(jnp.float32), n_in_p, n_hid_p),
            u=_pad2d(p["u"].astype(jnp.float32), n_in_p, n_dim_p),
            v=_pad2d(p["v"].astype(jnp.float32), n_hid_p, n_dim_p),
            b=_pad2d(p["b"].astype(jnp.float32), 1, n_hid_p),
        ))
    return dict(layers=layers, matmul_dtype=matmul_dtype)


def _compute_weff_and_reg(prepared):
    """Tiny prep pallas_call: per-layer W_eff (matmul dtype) + summed reg scalar."""
    layers = prepared["layers"]
    nl = len(layers)
    layer_cfg = tuple((L["n_in"], L["n_hid"], L["lambda_s"], L["lambda_2"])
                      for L in layers)
    vmem_spec = pl.BlockSpec(memory_space=pltpu.MemorySpace.VMEM)
    smem_spec = pl.BlockSpec(memory_space=pltpu.MemorySpace.SMEM)

    inputs = []
    for L in layers:
        inputs += [L["W"], L["u"], L["v"]]
    out_shape = tuple(
        jax.ShapeDtypeStruct((L["n_in_p"], L["n_hid_p"]), prepared["matmul_dtype"])
        for L in layers
    ) + (jax.ShapeDtypeStruct((1, 1), jnp.float32),)
    out_specs = tuple([vmem_spec] * nl) + (smem_spec,)

    in_bytes = sum(int(a.size) * 4 for a in inputs)
    out_bytes = sum(L["n_in_p"] * L["n_hid_p"] * 2 for L in layers)
    vmem_limit = min(max(2 * (in_bytes + out_bytes), 32 << 20), 56 << 20)

    outs = pl.pallas_call(
        functools.partial(_prep_kernel, layer_cfg=layer_cfg),
        out_shape=out_shape,
        in_specs=[vmem_spec] * (3 * nl),
        out_specs=out_specs,
        compiler_params=pltpu.CompilerParams(vmem_limit_bytes=vmem_limit),
    )(*inputs)
    return outs[:nl], outs[nl][0, 0]


def kernel_net_forward(x, prepared):
    """KernelNet forward: returns (y, total_reg) like the PyTorch module."""
    layers = prepared["layers"]
    nl = len(layers)
    M, n_feat = x.shape
    assert n_feat == layers[0]["n_in"]
    in0_p = layers[0]["n_in_p"]
    out_p = layers[-1]["n_hid_p"]
    n_out = layers[-1]["n_hid"]

    # 1) Parameter-only prep (separate small kernel — keeps the main kernel free
    #    of W/u/v buffers and of any cross-step state).
    weffs, reg = _compute_weff_and_reg(prepared)

    # 2) M tiling: cap the tile so double-buffered x/y tiles + resident W_eff fit
    #    v7x's 64 MiB VMEM (v6e/v5e have headroom to sweep the cap higher), and
    #    pick tm so the padded remainder stays below one tile.
    cap = 256
    num_tiles = max(1, -(-M // cap))
    tm = _round_up(-(-M // num_tiles), SUBLANE)
    m_pad = tm * num_tiles

    x = x.astype(jnp.float32)
    if (m_pad != M) or (in0_p != n_feat):
        # NOTE: at production sizes keep the rating matrix stored padded across
        # calls so this extra HBM pass disappears from the hot path.
        x = jnp.pad(x, ((0, m_pad - M), (0, in0_p - n_feat)))

    vmem_spec = pl.BlockSpec(memory_space=pltpu.MemorySpace.VMEM)
    param_inputs = []
    param_specs = []
    for l, L in enumerate(layers):
        param_inputs += [weffs[l], L["b"]]
        param_specs += [vmem_spec, vmem_spec]  # whole-array, single-buffered

    # Explicit VMEM budget: resident params (single copy) + double-buffered x/y.
    param_bytes = sum(int(w.size) * w.dtype.itemsize for w in weffs) \
        + sum(int(L["b"].size) * 4 for L in layers)
    io_bytes = 2 * (tm * in0_p * 4 + tm * out_p * 4)
    vmem_limit = min(max(int(1.5 * (param_bytes + io_bytes)) + (4 << 20), 32 << 20),
                     56 << 20)

    kern = functools.partial(
        _forward_kernel,
        apply_sigmoid=tuple(L["apply_sigmoid"] for L in layers),
        matmul_dtype=prepared["matmul_dtype"],
    )
    y = pl.pallas_call(
        kern,
        grid=(m_pad // tm,),
        out_shape=jax.ShapeDtypeStruct((m_pad, out_p), jnp.float32),
        in_specs=[pl.BlockSpec((tm, in0_p), lambda i: (i, 0))] + param_specs,
        out_specs=pl.BlockSpec((tm, out_p), lambda i: (i, 0)),
        compiler_params=pltpu.CompilerParams(
            # No cross-step state (prep is a separate kernel), so the M axis is
            # truly parallel -> shards across the two TensorCores on v7x.
            dimension_semantics=("parallel",),
            vmem_limit_bytes=vmem_limit,
        ),
    )(x, *param_inputs)

    if (m_pad != M) or (out_p != n_out):
        y = y[:M, :n_out]
    return y, reg


# ----------------------- parameter init (mirrors PyTorch) -----------------------
def xavier_uniform(key, shape, fan_in, fan_out, gain):
    bound = gain * jnp.sqrt(6.0 / (fan_in + fan_out))
    return jax.random.uniform(key, shape, jnp.float32, -bound, bound)


def init_kernel_layer(key, n_in, n_hid, n_dim, lambda_s, lambda_2, apply_sigmoid):
    gain = jnp.sqrt(2.0)  # torch.nn.init.calculate_gain('relu')
    kW, ku, kv = jax.random.split(key, 3)
    W = xavier_uniform(kW, (n_in, n_hid), n_in, n_hid, gain)
    # u: (n_in, 1, n_dim) -> fan_in = 1*n_dim, fan_out = n_in*n_dim; squeezed to (n_in, n_dim)
    u = xavier_uniform(ku, (n_in, n_dim), n_dim, n_in * n_dim, gain)
    # v: (1, n_hid, n_dim) -> fan_in = n_hid*n_dim, fan_out = 1*n_dim; squeezed to (n_hid, n_dim)
    v = xavier_uniform(kv, (n_hid, n_dim), n_hid * n_dim, n_dim, gain)
    b = jnp.zeros((1, n_hid), jnp.float32)
    return dict(W=W, u=u, v=v, b=b, lambda_s=lambda_s, lambda_2=lambda_2,
                apply_sigmoid=apply_sigmoid)


def init_kernel_net(key, n_u, n_hid, n_dim, n_layers, lambda_s, lambda_2):
    params = []
    keys = jax.random.split(key, n_layers + 1)
    for i in range(n_layers):
        n_in = n_u if i == 0 else n_hid
        params.append(init_kernel_layer(keys[i], n_in, n_hid, n_dim,
                                        lambda_s, lambda_2, apply_sigmoid=True))
    # final layer: n_hid -> n_u with Identity activation
    params.append(init_kernel_layer(keys[-1], n_hid, n_u, n_dim,
                                    lambda_s, lambda_2, apply_sigmoid=False))
    return params


# ----------------------- pure-JAX reference (eval-mode, f32) -----------------------
def kernel_net_reference(x, params):
    total = jnp.float32(0.0)
    h = x.astype(jnp.float32)
    for p in params:
        u, v, W, b = p["u"], p["v"], p["W"], p["b"]
        diff = u[:, None, :] - v[None, :, :]
        w_hat = jnp.maximum(1.0 - jnp.sum(diff * diff, axis=-1), 0.0)
        total = total + p["lambda_s"] * jnp.mean(w_hat * w_hat) \
                      + p["lambda_2"] * jnp.mean(W * W)
        h = h @ (W * w_hat) + b
        if p["apply_sigmoid"]:
            h = jax.nn.sigmoid(h)
    return h, total


if __name__ == "__main__":
    # Small shapes consistent with the module: n_u features, n_hid hidden, n_dim kernel dim.
    n_u, n_hid, n_dim, n_layers = 16, 32, 8, 2
    lambda_s, lambda_2 = 0.006, 20.0
    M = 8  # number of rows in the rating-matrix slice fed to the autoencoder

    key = jax.random.PRNGKey(0)
    k_params, k_x = jax.random.split(key)
    params = init_kernel_net(k_params, n_u, n_hid, n_dim, n_layers, lambda_s, lambda_2)
    x = jax.random.normal(k_x, (M, n_u), jnp.float32)

    prepared = prepare_kernel_net(params)  # pad/cast once, reuse across forwards
    y, total_reg = kernel_net_forward(x, prepared)
    jax.block_until_ready((y, total_reg))
    assert y.shape == (M, n_u)
    assert total_reg.shape == ()

    y_ref, reg_ref = kernel_net_reference(x, params)
    # y uses bf16 operands (f32 accumulation) -> tolerance loosened accordingly;
    # reg is computed fully in f32 so the tight tolerance stays.
    assert jnp.allclose(y, y_ref, rtol=2e-2, atol=2e-2)
    assert jnp.allclose(total_reg, reg_ref, rtol=1e-3, atol=1e-3)
    print("KERNEL_OK")
</pallas_src>

<mosaic_0001>
module attributes {stable_mosaic.version = 11 : i64} {
  func.func @_prep_kernel(%arg0: memref<128x128xf32, #tpu.memory_space<vmem>>, %arg1: memref<128x128xf32, #tpu.memory_space<vmem>>, %arg2: memref<128x128xf32, #tpu.memory_space<vmem>>, %arg3: memref<128x128xf32, #tpu.memory_space<vmem>>, %arg4: memref<128x128xf32, #tpu.memory_space<vmem>>, %arg5: memref<128x128xf32, #tpu.memory_space<vmem>>, %arg6: memref<128x128xf32, #tpu.memory_space<vmem>>, %arg7: memref<128x128xf32, #tpu.memory_space<vmem>>, %arg8: memref<128x128xf32, #tpu.memory_space<vmem>>, %arg9: memref<128x128xbf16, #tpu.memory_space<vmem>>, %arg10: memref<128x128xbf16, #tpu.memory_space<vmem>>, %arg11: memref<128x128xbf16, #tpu.memory_space<vmem>>, %arg12: memref<1x1xf32, #tpu.memory_space<smem>>) attributes {dimension_semantics = [], scalar_prefetch = 0 : i64, scratch_operands = 0 : i64, tpu.core_type = #tpu.core_type<tc>} {
    %c0 = arith.constant 0 : index
    %c0_0 = arith.constant 0 : index
    %0 = vector.load %arg0[%c0, %c0_0] : memref<128x128xf32, #tpu.memory_space<vmem>>, vector<128x128xf32>
    %c0_1 = arith.constant 0 : index
    %c0_2 = arith.constant 0 : index
    %1 = vector.load %arg1[%c0_1, %c0_2] : memref<128x128xf32, #tpu.memory_space<vmem>>, vector<128x128xf32>
    %c0_3 = arith.constant 0 : index
    %c0_4 = arith.constant 0 : index
    %2 = vector.load %arg2[%c0_3, %c0_4] : memref<128x128xf32, #tpu.memory_space<vmem>>, vector<128x128xf32>
    %3 = arith.mulf %1, %1 : vector<128x128xf32>
    %cst = arith.constant dense<0.000000e+00> : vector<128xf32>
    %4 = vector.multi_reduction <add>, %3, %cst [1] : vector<128x128xf32> to vector<128xf32>
    %5 = vector.shape_cast %4 : vector<128xf32> to vector<128x1xf32>
    %cst_5 = arith.constant 1.000000e+00 : f32
    %6 = vector.broadcast %cst_5 : f32 to vector<1x128xf32>
    %7 = arith.mulf %2, %2 : vector<128x128xf32>
    %cst_6 = arith.constant dense<0.000000e+00> : vector<1x128xf32>
    %8 = tpu.matmul %6, %7, %cst_6 {dimension_numbers = #tpu.dot_dimension_numbers<[1], [1], [0], [0], [0, 0, 1, 0], [], []>} : vector<1x128xf32>, vector<128x128xf32>, vector<1x128xf32> -> vector<1x128xf32>
    %cst_7 = arith.constant dense<0.000000e+00> : vector<128x128xf32>
    %9 = tpu.matmul %1, %2, %cst_7 {dimension_numbers = #tpu.dot_dimension_numbers<[1], [1], [0], [0], [0, 0, 1, 0], [], []>} : vector<128x128xf32>, vector<128x128xf32>, vector<128x128xf32> -> vector<128x128xf32>
    %10 = vector.broadcast %5 : vector<128x1xf32> to vector<128x128xf32>
    %11 = vector.broadcast %8 : vector<1x128xf32> to vector<128x128xf32>
    %12 = arith.addf %10, %11 : vector<128x128xf32>
    %cst_8 = arith.constant 2.000000e+00 : f32
    %13 = vector.broadcast %cst_8 : f32 to vector<128x128xf32>
    %14 = arith.mulf %13, %9 : vector<128x128xf32>
    %15 = arith.subf %12, %14 : vector<128x128xf32>
    %cst_9 = arith.constant 1.000000e+00 : f32
    %16 = vector.broadcast %cst_9 : f32 to vector<128x128xf32>
    %17 = arith.subf %16, %15 : vector<128x128xf32>
    %cst_10 = arith.constant 0.000000e+00 : f32
    %18 = vector.broadcast %cst_10 : f32 to vector<128x128xf32>
    %19 = arith.maximumf %17, %18 : vector<128x128xf32>
    %20 = tpu.iota {dimensions = array<i32: 0>} : vector<128x128xi32>
    %c16_i32 = arith.constant 16 : i32
    %21 = vector.broadcast %c16_i32 : i32 to vector<128x128xi32>
    %22 = arith.cmpi slt, %20, %21 : vector<128x128xi32>
    %23 = tpu.iota {dimensions = array<i32: 1>} : vector<128x128xi32>
    %c32_i32 = arith.constant 32 : i32
    %24 = vector.broadcast %c32_i32 : i32 to vector<128x128xi32>
    %25 = arith.cmpi slt, %23, %24 : vector<128x128xi32>
    %26 = arith.andi %22, %25 : vector<128x128xi1>
    %cst_11 = arith.constant 0.000000e+00 : f32
    %27 = vector.broadcast %cst_11 : f32 to vector<128x128xf32>
    %28 = arith.select %26, %19, %27 : vector<128x128xi1>, vector<128x128xf32>
    %29 = arith.mulf %28, %28 : vector<128x128xf32>
    %30 = vector.shape_cast %29 : vector<128x128xf32> to vector<1x128x128xf32>
    %cst_12 = arith.constant dense<0.000000e+00> : vector<1xf32>
    %31 = vector.multi_reduction <add>, %30, %cst_12 [1, 2] : vector<1x128x128xf32> to vector<1xf32>
    %32 = vector.shape_cast %31 : vector<1xf32> to vector<1x1x1xf32>
    %33 = vector.extract %32[0, 0, 0] : f32 from vector<1x1x1xf32>
    %cst_13 = arith.constant 5.120000e+02 : f32
    %34 = arith.divf %33, %cst_13 : f32
    %cst_14 = arith.constant 6.000000e-03 : f32
    %35 = arith.mulf %cst_14, %34 : f32
    %cst_15 = arith.constant 0.000000e+00 : f32
    %36 = arith.addf %cst_15, %35 : f32
    %37 = arith.mulf %0, %0 : vector<128x128xf32>
    %38 = vector.shape_cast %37 : vector<128x128xf32> to vector<1x128x128xf32>
    %cst_16 = arith.constant dense<0.000000e+00> : vector<1xf32>
    %39 = vector.multi_reduction <add>, %38, %cst_16 [1, 2] : vector<1x128x128xf32> to vector<1xf32>
    %40 = vector.shape_cast %39 : vector<1xf32> to vector<1x1x1xf32>
    %41 = vector.extract %40[0, 0, 0] : f32 from vector<1x1x1xf32>
    %cst_17 = arith.constant 5.120000e+02 : f32
    %42 = arith.divf %41, %cst_17 : f32
    %cst_18 = arith.constant 2.000000e+01 : f32
    %43 = arith.mulf %cst_18, %42 : f32
    %44 = arith.addf %36, %43 : f32
    %45 = arith.mulf %0, %28 : vector<128x128xf32>
    %46 = arith.truncf %45 : vector<128x128xf32> to vector<128x128xbf16>
    %c0_19 = arith.constant 0 : index
    %c0_20 = arith.constant 0 : index
    %47 = vector.load %arg9[%c0_19, %c0_20] : memref<128x128xbf16, #tpu.memory_space<vmem>>, vector<128x128xbf16>
    tpu.vector_store %arg9[%c0_19, %c0_20], %46 {strides = array<i32>} : memref<128x128xbf16, #tpu.memory_space<vmem>>, vector<128x128xbf16>,
    %c0_21 = arith.constant 0 : index
    %c0_22 = arith.constant 0 : index
    %48 = vector.load %arg3[%c0_21, %c0_22] : memref<128x128xf32, #tpu.memory_space<vmem>>, vector<128x128xf32>
    %c0_23 = arith.constant 0 : index
    %c0_24 = arith.constant 0 : index
    %49 = vector.load %arg4[%c0_23, %c0_24] : memref<128x128xf32, #tpu.memory_space<vmem>>, vector<128x128xf32>
    %c0_25 = arith.constant 0 : index
    %c0_26 = arith.constant 0 : index
    %50 = vector.load %arg5[%c0_25, %c0_26] : memref<128x128xf32, #tpu.memory_space<vmem>>, vector<128x128xf32>
    %51 = arith.mulf %49, %49 : vector<128x128xf32>
    %cst_27 = arith.constant dense<0.000000e+00> : vector<128xf32>
    %52 = vector.multi_reduction <add>, %51, %cst_27 [1] : vector<128x128xf32> to vector<128xf32>
    %53 = vector.shape_cast %52 : vector<128xf32> to vector<128x1xf32>
    %cst_28 = arith.constant 1.000000e+00 : f32
    %54 = vector.broadcast %cst_28 : f32 to vector<1x128xf32>
    %55 = arith.mulf %50, %50 : vector<128x128xf32>
    %cst_29 = arith.constant dense<0.000000e+00> : vector<1x128xf32>
    %56 = tpu.matmul %54, %55, %cst_29 {dimension_numbers = #tpu.dot_dimension_numbers<[1], [1], [0], [0], [0, 0, 1, 0], [], []>} : vector<1x128xf32>, vector<128x128xf32>, vector<1x128xf32> -> vector<1x128xf32>
    %cst_30 = arith.constant dense<0.000000e+00> : vector<128x128xf32>
    %57 = tpu.matmul %49, %50, %cst_30 {dimension_numbers = #tpu.dot_dimension_numbers<[1], [1], [0], [0], [0, 0, 1, 0], [], []>} : vector<128x128xf32>, vector<128x128xf32>, vector<128x128xf32> -> vector<128x128xf32>
    %58 = vector.broadcast %53 : vector<128x1xf32> to vector<128x128xf32>
    %59 = vector.broadcast %56 : vector<1x128xf32> to vector<128x128xf32>
    %60 = arith.addf %58, %59 : vector<128x128xf32>
    %cst_31 = arith.constant 2.000000e+00 : f32
    %61 = vector.broadcast %cst_31 : f32 to vector<128x128xf32>
    %62 = arith.mulf %61, %57 : vector<128x128xf32>
    %63 = arith.subf %60, %62 : vector<128x128xf32>
    %cst_32 = arith.constant 1.000000e+00 : f32
    %64 = vector.broadcast %cst_32 : f32 to vector<128x128xf32>
    %65 = arith.subf %64, %63 : vector<128x128xf32>
    %cst_33 = arith.constant 0.000000e+00 : f32
    %66 = vector.broadcast %cst_33 : f32 to vector<128x128xf32>
    %67 = arith.maximumf %65, %66 : vector<128x128xf32>
    %68 = tpu.iota {dimensions = array<i32: 0>} : vector<128x128xi32>
    %c32_i32_34 = arith.constant 32 : i32
    %69 = vector.broadcast %c32_i32_34 : i32 to vector<128x128xi32>
    %70 = arith.cmpi slt, %68, %69 : vector<128x128xi32>
    %71 = tpu.iota {dimensions = array<i32: 1>} : vector<128x128xi32>
    %c32_i32_35 = arith.constant 32 : i32
    %72 = vector.broadcast %c32_i32_35 : i32 to vector<128x128xi32>
    %73 = arith.cmpi slt, %71, %72 : vector<128x128xi32>
    %74 = arith.andi %70, %73 : vector<128x128xi1>
    %cst_36 = arith.constant 0.000000e+00 : f32
    %75 = vector.broadcast %cst_36 : f32 to vector<128x128xf32>
    %76 = arith.select %74, %67, %75 : vector<128x128xi1>, vector<128x128xf32>
    %77 = arith.mulf %76, %76 : vector<128x128xf32>
    %78 = vector.shape_cast %77 : vector<128x128xf32> to vector<1x128x128xf32>
    %cst_37 = arith.constant dense<0.000000e+00> : vector<1xf32>
    %79 = vector.multi_reduction <add>, %78, %cst_37 [1, 2] : vector<1x128x128xf32> to vector<1xf32>
    %80 = vector.shape_cast %79 : vector<1xf32> to vector<1x1x1xf32>
    %81 = vector.extract %80[0, 0, 0] : f32 from vector<1x1x1xf32>
    %cst_38 = arith.constant 1.024000e+03 : f32
    %82 = arith.divf %81, %cst_38 : f32
    %cst_39 = arith.constant 6.000000e-03 : f32
    %83 = arith.mulf %cst_39, %82 : f32
    %84 = arith.addf %44, %83 : f32
    %85 = arith.mulf %48, %48 : vector<128x128xf32>
    %86 = vector.shape_cast %85 : vector<128x128xf32> to vector<1x128x128xf32>
    %cst_40 = arith.constant dense<0.000000e+00> : vector<1xf32>
    %87 = vector.multi_reduction <add>, %86, %cst_40 [1, 2] : vector<1x128x128xf32> to vector<1xf32>
    %88 = vector.shape_cast %87 : vector<1xf32> to vector<1x1x1xf32>
    %89 = vector.extract %88[0, 0, 0] : f32 from vector<1x1x1xf32>
    %cst_41 = arith.constant 1.024000e+03 : f32
    %90 = arith.divf %89, %cst_41 : f32
    %cst_42 = arith.constant 2.000000e+01 : f32
    %91 = arith.mulf %cst_42, %90 : f32
    %92 = arith.addf %84, %91 : f32
    %93 = arith.mulf %48, %76 : vector<128x128xf32>
    %94 = arith.truncf %93 : vector<128x128xf32> to vector<128x128xbf16>
    %c0_43 = arith.constant 0 : index
    %c0_44 = arith.constant 0 : index
    %95 = vector.load %arg10[%c0_43, %c0_44] : memref<128x128xbf16, #tpu.memory_space<vmem>>, vector<128x128xbf16>
    tpu.vector_store %arg10[%c0_43, %c0_44], %94 {strides = array<i32>} : memref<128x128xbf16, #tpu.memory_space<vmem>>, vector<128x128xbf16>,
    %c0_45 = arith.constant 0 : index
    %c0_46 = arith.constant 0 : index
    %96 = vector.load %arg6[%c0_45, %c0_46] : memref<128x128xf32, #tpu.memory_space<vmem>>, vector<128x128xf32>
    %c0_47 = arith.constant 0 : index
    %c0_48 = arith.constant 0 : index
    %97 = vector.load %arg7[%c0_47, %c0_48] : memref<128x128xf32, #tpu.memory_space<vmem>>, vector<128x128xf32>
    %c0_49 = arith.constant 0 : index
    %c0_50 = arith.constant 0 : index
    %98 = vector.load %arg8[%c0_49, %c0_50] : memref<128x128xf32, #tpu.memory_space<vmem>>, vector<128x128xf32>
    %99 = arith.mulf %97, %97 : vector<128x128xf32>
    %cst_51 = arith.constant dense<0.000000e+00> : vector<128xf32>
    %100 = vector.multi_reduction <add>, %99, %cst_51 [1] : vector<128x128xf32> to vector<128xf32>
    %101 = vector.shape_cast %100 : vector<128xf32> to vector<128x1xf32>
    %cst_52 = arith.constant 1.000000e+00 : f32
    %102 = vector.broadcast %cst_52 : f32 to vector<1x128xf32>
    %103 = arith.mulf %98, %98 : vector<128x128xf32>
    %cst_53 = arith.constant dense<0.000000e+00> : vector<1x128xf32>
    %104 = tpu.matmul %102, %103, %cst_53 {dimension_numbers = #tpu.dot_dimension_numbers<[1], [1], [0], [0], [0, 0, 1, 0], [], []>} : vector<1x128xf32>, vector<128x128xf32>, vector<1x128xf32> -> vector<1x128xf32>
    %cst_54 = arith.constant dense<0.000000e+00> : vector<128x128xf32>
    %105 = tpu.matmul %97, %98, %cst_54 {dimension_numbers = #tpu.dot_dimension_numbers<[1], [1], [0], [0], [0, 0, 1, 0], [], []>} : vector<128x128xf32>, vector<128x128xf32>, vector<128x128xf32> -> vector<128x128xf32>
    %106 = vector.broadcast %101 : vector<128x1xf32> to vector<128x128xf32>
    %107 = vector.broadcast %104 : vector<1x128xf32> to vector<128x128xf32>
    %108 = arith.addf %106, %107 : vector<128x128xf32>
    %cst_55 = arith.constant 2.000000e+00 : f32
    %109 = vector.broadcast %cst_55 : f32 to vector<128x128xf32>
    %110 = arith.mulf %109, %105 : vector<128x128xf32>
    %111 = arith.subf %108, %110 : vector<128x128xf32>
    %cst_56 = arith.constant 1.000000e+00 : f32
    %112 = vector.broadcast %cst_56 : f32 to vector<128x128xf32>
    %113 = arith.subf %112, %111 : vector<128x128xf32>
    %cst_57 = arith.constant 0.000000e+00 : f32
    %114 = vector.broadcast %cst_57 : f32 to vector<128x128xf32>
    %115 = arith.maximumf %113, %114 : vector<128x128xf32>
    %116 = tpu.iota {dimensions = array<i32: 0>} : vector<128x128xi32>
    %c32_i32_58 = arith.constant 32 : i32
    %117 = vector.broadcast %c32_i32_58 : i32 to vector<128x128xi32>
    %118 = arith.cmpi slt, %116, %117 : vector<128x128xi32>
    %119 = tpu.iota {dimensions = array<i32: 1>} : vector<128x128xi32>
    %c16_i32_59 = arith.constant 16 : i32
    %120 = vector.broadcast %c16_i32_59 : i32 to vector<128x128xi32>
    %121 = arith.cmpi slt, %119, %120 : vector<128x128xi32>
    %122 = arith.andi %118, %121 : vector<128x128xi1>
    %cst_60 = arith.constant 0.000000e+00 : f32
    %123 = vector.broadcast %cst_60 : f32 to vector<128x128xf32>
    %124 = arith.select %122, %115, %123 : vector<128x128xi1>, vector<128x128xf32>
    %125 = arith.mulf %124, %124 : vector<128x128xf32>
    %126 = vector.shape_cast %125 : vector<128x128xf32> to vector<1x128x128xf32>
    %cst_61 = arith.constant dense<0.000000e+00> : vector<1xf32>
    %127 = vector.multi_reduction <add>, %126, %cst_61 [1, 2] : vector<1x128x128xf32> to vector<1xf32>
    %128 = vector.shape_cast %127 : vector<1xf32> to vector<1x1x1xf32>
    %129 = vector.extract %128[0, 0, 0] : f32 from vector<1x1x1xf32>
    %cst_62 = arith.constant 5.120000e+02 : f32
    %130 = arith.divf %129, %cst_62 : f32
    %cst_63 = arith.constant 6.000000e-03 : f32
    %131 = arith.mulf %cst_63, %130 : f32
    %132 = arith.addf %92, %131 : f32
    %133 = arith.mulf %96, %96 : vector<128x128xf32>
    %134 = vector.shape_cast %133 : vector<128x128xf32> to vector<1x128x128xf32>
    %cst_64 = arith.constant dense<0.000000e+00> : vector<1xf32>
    %135 = vector.multi_reduction <add>, %134, %cst_64 [1, 2] : vector<1x128x128xf32> to vector<1xf32>
    %136 = vector.shape_cast %135 : vector<1xf32> to vector<1x1x1xf32>
    %137 = vector.extract %136[0, 0, 0] : f32 from vector<1x1x1xf32>
    %cst_65 = arith.constant 5.120000e+02 : f32
    %138 = arith.divf %137, %cst_65 : f32
    %cst_66 = arith.constant 2.000000e+01 : f32
    %139 = arith.mulf %cst_66, %138 : f32
    %140 = arith.addf %132, %139 : f32
    %141 = arith.mulf %96, %124 : vector<128x128xf32>
    %142 = arith.truncf %141 : vector<128x128xf32> to vector<128x128xbf16>
    %c0_67 = arith.constant 0 : index
    %c0_68 = arith.constant 0 : index
    %143 = vector.load %arg11[%c0_67, %c0_68] : memref<128x128xbf16, #tpu.memory_space<vmem>>, vector<128x128xbf16>
    tpu.vector_store %arg11[%c0_67, %c0_68], %142 {strides = array<i32>} : memref<128x128xbf16, #tpu.memory_space<vmem>>, vector<128x128xbf16>,
    %c0_69 = arith.constant 0 : index
    %c0_70 = arith.constant 0 : index
    %144 = memref.load %arg12[%c0_69, %c0_70] : memref<1x1xf32, #tpu.memory_space<smem>>
    memref.store %140, %arg12[%c0_69, %c0_70] : memref<1x1xf32, #tpu.memory_space<smem>>
    return
  }
}

</mosaic_0001>

<bundles_post_ra>
// kernel: tpu_custom_call.1
= control target key start
LH: loop header
LB: loop body
LE: loop exit
PB: predicated region body
PF: predicated region fallthrough
CT: control target
= control target key end

     0   :  { %18 = vsyncpa [#allocation3], 0  ;;  %s3848_s0 = inlined_call_operand.hbm [shape: f32[128,128], index: 0, kind: input, shape index: {}]   ;;  %s3849_s1 = inlined_call_operand.hbm [shape: f32[128,128], index: 1, kind: input, shape index: {}]   ;;  %s3850_s2 = inlined_call_operand.hbm [shape: f32[128,128], index: 2, kind: input, shape index: {}]   ;;  %s3851_s3 = inlined_call_operand.hbm [shape: f32[128,128], index: 3, kind: input, shape index: {}]   ;;  %s3852_s4 = inlined_call_operand.hbm [shape: f32[128,128], index: 4, kind: input, shape index: {}]   ;;  %s3853_s5 = inlined_call_operand.hbm [shape: f32[128,128], index: 5, kind: input, shape index: {}]   ;;  %s3854_s6 = inlined_call_operand.hbm [shape: f32[128,128], index: 6, kind: input, shape index: {}]   ;;  %s3855_s7 = inlined_call_operand.hbm [shape: f32[128,128], index: 7, kind: input, shape index: {}]   ;;  %s3856_s8 = inlined_call_operand.hbm [shape: f32[128,128], index: 8, kind: input, shape index: {}]   ;;  %s3857_s9 = inlined_call_operand.hbm [shape: bf16[128,128], index: 9, kind: output, shape index: {0}]   ;;  %s3858_s10 = inlined_call_operand.hbm [shape: bf16[128,128], index: 10, kind: output, shape index: {1}]   ;;  %s3859_s11 = inlined_call_operand.hbm [shape: bf16[128,128], index: 11, kind: output, shape index: {2}]   ;;  %s3860_s12 = inlined_call_operand.hbm [shape: f32[1,1], index: 12, kind: output, shape index: {3}]  }
   0x1   :  { %19 = vsyncpa [#allocation7], 0 }
   0x2   :  { %20 = vsyncpa [#allocation10], 0 }
   0x3   :  { %21 = vsyncpa [#allocation13], 0 }
   0x4   :  { %22 = vsyncpa [#allocation16], 0 }
   0x5   :  { %23 = vsyncpa [#allocation4], 0 }
   0x6   :  { %24 = vsyncpa [#allocation20], 0 }
   0x7   :  { %25 = vsyncpa [#allocation5], 0  ;;  %s3316_s21 = smov [#allocation6]   ;;  %s3317_s23 = smov [#allocation9]  }
   0x8   :  { %s43_s22 = sshll.u32 %s3316_s21, 4  ;;  %s67_s24 = sshll.u32 %s3317_s23, 4  ;;  %s44_s22 = int_to_ptr.vmem [resolvable:$true] %s43_s22  ;;  %s3402_s24 = int_to_ptr.vmem [resolvable:$true] %s67_s24 }
   0x9   :  { %s3026_s27 = scalar_lea.hbm %s3849_s1, 2048 }
   0xa   :  { %p3027_p0 = scmp.ne.s32.totalorder %s3849_s1, %s3026_s27  ;;  %p3030_p1 = scmp.lt.u32.totalorder %s3026_s27, %s3849_s1 }
   0xc   :  { %p3032_p2 = pnand %p3030_p1, %p3027_p0 }
   0xe   :  { %3035 = shalt.err (!%p3032_p2)
}
   0xf   :  { %s3036_s14 = scalar_lea.vmem %s44_s22, 2048  ;;  %p3041_p4 = scmp.lt.s32.totalorder %s44_s22, %s44_s22 }
  0x10   :  { %p3037_p3 = scmp.ne.s32.totalorder %s44_s22, %s3036_s14  ;;  %p3042_p5 = scmp.lt.s32.totalorder %s3036_s14, %s3036_s14 }
  0x12   :  { %p3043_p6 = por %p3042_p5, %p3041_p4 }
  0x14   :  { %p3044_p7 = pnand %p3043_p6, %p3037_p3 }
  0x16   :  { %3047 = shalt.err (!%p3044_p7)
}
  0x17   :  { %s3318_s15 = smov 128   ;;  %s3319_s16 = smov 8  }
  0x18   :  { %49 = dma.hbm_to_vmem [thread:$0]  %s3849_s1, 2048, %s44_s22, [#allocation7], %s3318_s15, %s3318_s15, %s3319_s16  }
  0x19   :  { %s3048_s21 = scalar_lea.hbm %s3851_s3, 2048 }
  0x1a   :  { %p3049_p8 = scmp.ne.s32.totalorder %s3851_s3, %s3048_s21  ;;  %p3052_p9 = scmp.lt.u32.totalorder %s3048_s21, %s3851_s3 }
  0x1c   :  { %p3054_p10 = pnand %p3052_p9, %p3049_p8 }
  0x1e   :  { %3057 = shalt.err (!%p3054_p10)
}
  0x1f   :  { %s3058_s28 = scalar_lea.vmem %s3402_s24, 2048  ;;  %p3063_p12 = scmp.lt.s32.totalorder %s3402_s24, %s3402_s24 }
  0x20   :  { %p3059_p11 = scmp.ne.s32.totalorder %s3402_s24, %s3058_s28  ;;  %p3064_p13 = scmp.lt.s32.totalorder %s3058_s28, %s3058_s28 }
  0x22   :  { %p3065_p0 = por %p3064_p13, %p3063_p12 }
  0x24   :  { %p3066_p1 = pnand %p3065_p0, %p3059_p11 }
  0x26   :  { %3069 = shalt.err (!%p3066_p1)
}
  0x27   :  { %73 = dma.hbm_to_vmem [thread:$0]  %s3851_s3, 2048, %s3402_s24, [#allocation10], %s3318_s15, %s3318_s15, %s3319_s16  }
  0x28   :  { %s3320_s29 = smov [#allocation12]   ;;  %s3321_s13 = smov [#allocation15]  }
  0x29   :  { %s91_s30 = sshll.u32 %s3320_s29, 4  ;;  %s115_s14 = sshll.u32 %s3321_s13, 4  ;;  %s92_s30 = int_to_ptr.vmem [resolvable:$true] %s91_s30  ;;  %s3439_s14 = int_to_ptr.vmem [resolvable:$true] %s115_s14 }
  0x2a   :  { %s3070_s19 = scalar_lea.hbm %s3853_s5, 2048 }
  0x2b   :  { %p3071_p2 = scmp.ne.s32.totalorder %s3853_s5, %s3070_s19  ;;  %p3074_p3 = scmp.lt.u32.totalorder %s3070_s19, %s3853_s5 }
  0x2d   :  { %p3076_p4 = pnand %p3074_p3, %p3071_p2 }
  0x2f   :  { %3079 = shalt.err (!%p3076_p4)
}
  0x30   :  { %s3080_s3 = scalar_lea.vmem %s92_s30, 2048  ;;  %p3085_p6 = scmp.lt.s32.totalorder %s92_s30, %s92_s30 }
  0x31   :  { %p3081_p5 = scmp.ne.s32.totalorder %s92_s30, %s3080_s3  ;;  %p3086_p7 = scmp.lt.s32.totalorder %s3080_s3, %s3080_s3 }
  0x33   :  { %p3087_p8 = por %p3086_p7, %p3085_p6 }
  0x35   :  { %p3088_p9 = pnand %p3087_p8, %p3081_p5 }
  0x37   :  { %3091 = shalt.err (!%p3088_p9)
}
  0x38   :  { %97 = dma.hbm_to_vmem [thread:$0]  %s3853_s5, 2048, %s92_s30, [#allocation13], %s3318_s15, %s3318_s15, %s3319_s16  }
  0x39   :  { %s3092_s1 = scalar_lea.hbm %s3855_s7, 2048 }
  0x3a   :  { %p3093_p10 = scmp.ne.s32.totalorder %s3855_s7, %s3092_s1  ;;  %p3096_p11 = scmp.lt.u32.totalorder %s3092_s1, %s3855_s7 }
  0x3c   :  { %p3098_p12 = pnand %p3096_p11, %p3093_p10 }
  0x3e   :  { %3101 = shalt.err (!%p3098_p12)
}
  0x3f   :  { %s3102_s18 = scalar_lea.vmem %s3439_s14, 2048  ;;  %p3107_p0 = scmp.lt.s32.totalorder %s3439_s14, %s3439_s14 }
  0x40   :  { %p3103_p13 = scmp.ne.s32.totalorder %s3439_s14, %s3102_s18  ;;  %p3108_p1 = scmp.lt.s32.totalorder %s3102_s18, %s3102_s18 }
  0x42   :  { %p3109_p2 = por %p3108_p1, %p3107_p0 }
  0x44   :  { %p3110_p3 = pnand %p3109_p2, %p3103_p13 }
  0x46   :  { %3113 = shalt.err (!%p3110_p3)
}
  0x47   :  { %121 = dma.hbm_to_vmem [thread:$0]  %s3855_s7, 2048, %s3439_s14, [#allocation16], %s3318_s15, %s3318_s15, %s3319_s16  }
  0x48   :  { %s3322_s19 = smov [#allocation2]   ;;  %s3323_s21 = smov [#allocation8]  }
  0x49   :  { %s31_s20 = sshll.u32 %s3322_s19, 4  ;;  %s55_s23 = sshll.u32 %s3323_s21, 4  ;;  %s32_s20 = int_to_ptr.vmem [resolvable:$true] %s31_s20  ;;  %s3476_s23 = int_to_ptr.vmem [resolvable:$true] %s55_s23 }
  0x4a   :  { %s3114_s24 = scalar_lea.hbm %s3848_s0, 2048 }
  0x4b   :  { %p3115_p4 = scmp.ne.s32.totalorder %s3848_s0, %s3114_s24  ;;  %p3118_p5 = scmp.lt.u32.totalorder %s3114_s24, %s3848_s0 }
  0x4d   :  { %p3120_p6 = pnand %p3118_p5, %p3115_p4 }
  0x4f   :  { %3123 = shalt.err (!%p3120_p6)
}
  0x50   :  { %s3124_s7 = scalar_lea.vmem %s32_s20, 2048  ;;  %p3129_p8 = scmp.lt.s32.totalorder %s32_s20, %s32_s20 }
  0x51   :  { %p3125_p7 = scmp.ne.s32.totalorder %s32_s20, %s3124_s7  ;;  %p3130_p9 = scmp.lt.s32.totalorder %s3124_s7, %s3124_s7 }
  0x53   :  { %p3131_p10 = por %p3130_p9, %p3129_p8 }
  0x55   :  { %p3132_p11 = pnand %p3131_p10, %p3125_p7 }
  0x57   :  { %3135 = shalt.err (!%p3132_p11)
}
  0x58   :  { %37 = dma.hbm_to_vmem [thread:$0]  %s3848_s0, 2048, %s32_s20, [#allocation3], %s3318_s15, %s3318_s15, %s3319_s16  }
  0x59   :  { %s3136_s17 = scalar_lea.hbm %s3850_s2, 2048 }
  0x5a   :  { %p3137_p12 = scmp.ne.s32.totalorder %s3850_s2, %s3136_s17  ;;  %p3140_p13 = scmp.lt.u32.totalorder %s3136_s17, %s3850_s2 }
  0x5c   :  { %p3142_p0 = pnand %p3140_p13, %p3137_p12 }
  0x5e   :  { %3145 = shalt.err (!%p3142_p0)
}
  0x5f   :  { %s3146_s21 = scalar_lea.vmem %s3476_s23, 2048  ;;  %p3151_p2 = scmp.lt.s32.totalorder %s3476_s23, %s3476_s23 }
  0x60   :  { %p3147_p1 = scmp.ne.s32.totalorder %s3476_s23, %s3146_s21  ;;  %p3152_p3 = scmp.lt.s32.totalorder %s3146_s21, %s3146_s21 }
  0x62   :  { %p3153_p4 = por %p3152_p3, %p3151_p2 }
  0x64   :  { %p3154_p5 = pnand %p3153_p4, %p3147_p1 }
  0x66   :  { %3157 = shalt.err (!%p3154_p5)
}
  0x67   :  { %61 = dma.hbm_to_vmem [thread:$0]  %s3850_s2, 2048, %s3476_s23, [#allocation7], %s3318_s15, %s3318_s15, %s3319_s16  }
  0x68   :  { %s3324_s25 = smov [#allocation11]   ;;  %s3325_s24 = smov [#allocation14]  }
  0x69   :  { %s79_s3 = sshll.u32 %s3324_s25, 4  ;;  %s103_s26 = sshll.u32 %s3325_s24, 4  ;;  %s80_s3 = int_to_ptr.vmem [resolvable:$true] %s79_s3  ;;  %s3513_s26 = int_to_ptr.vmem [resolvable:$true] %s103_s26 }
  0x6a   :  { %s3158_s1 = scalar_lea.hbm %s3852_s4, 2048 }
  0x6b   :  { %p3159_p6 = scmp.ne.s32.totalorder %s3852_s4, %s3158_s1  ;;  %p3162_p7 = scmp.lt.u32.totalorder %s3158_s1, %s3852_s4 }
  0x6d   :  { %p3164_p8 = pnand %p3162_p7, %p3159_p6 }
  0x6f   :  { %3167 = shalt.err (!%p3164_p8)
}
  0x70   :  { %s3168_s2 = scalar_lea.vmem %s80_s3, 2048  ;;  %p3173_p10 = scmp.lt.s32.totalorder %s80_s3, %s80_s3 }
  0x71   :  { %p3169_p9 = scmp.ne.s32.totalorder %s80_s3, %s3168_s2  ;;  %p3174_p11 = scmp.lt.s32.totalorder %s3168_s2, %s3168_s2 }
  0x73   :  { %p3175_p12 = por %p3174_p11, %p3173_p10 }
  0x75   :  { %p3176_p13 = pnand %p3175_p12, %p3169_p9 }
  0x77   :  { %3179 = shalt.err (!%p3176_p13)
}
  0x78   :  { %85 = dma.hbm_to_vmem [thread:$0]  %s3852_s4, 2048, %s80_s3, [#allocation10], %s3318_s15, %s3318_s15, %s3319_s16  }
  0x79   :  { %s3180_s5 = scalar_lea.hbm %s3854_s6, 2048 }
  0x7a   :  { %p3181_p0 = scmp.ne.s32.totalorder %s3854_s6, %s3180_s5  ;;  %p3184_p1 = scmp.lt.u32.totalorder %s3180_s5, %s3854_s6 }
  0x7c   :  { %p3186_p2 = pnand %p3184_p1, %p3181_p0 }
  0x7e   :  { %3189 = shalt.err (!%p3186_p2)
}
  0x7f   :  { %s3190_s20 = scalar_lea.vmem %s3513_s26, 2048  ;;  %p3195_p4 = scmp.lt.s32.totalorder %s3513_s26, %s3513_s26 }
  0x80   :  { %p3191_p3 = scmp.ne.s32.totalorder %s3513_s26, %s3190_s20  ;;  %p3196_p5 = scmp.lt.s32.totalorder %s3190_s20, %s3190_s20 }
  0x82   :  { %p3197_p6 = por %p3196_p5, %p3195_p4 }
  0x84   :  { %p3198_p7 = pnand %p3197_p6, %p3191_p3 }
  0x86   :  { %3201 = shalt.err (!%p3198_p7)
}
  0x87   :  { %109 = dma.hbm_to_vmem [thread:$0]  %s3854_s6, 2048, %s3513_s26, [#allocation13], %s3318_s15, %s3318_s15, %s3319_s16  }
  0x88   :  { %s3326_s3 = smov [#allocation17]   ;;  %s3202_s1 = scalar_lea.hbm %s3856_s8, 2048 }
  0x89   :  { %s127_s24 = sshll.u32 %s3326_s3, 4  ;;  %p3203_p8 = scmp.ne.s32.totalorder %s3856_s8, %s3202_s1  ;;  %s128_s24 = int_to_ptr.vmem [resolvable:$true] %s127_s24 }
  0x8a   :  { %p3206_p9 = scmp.lt.u32.totalorder %s3202_s1, %s3856_s8 }
  0x8c   :  { %p3208_p10 = pnand %p3206_p9, %p3203_p8 }
  0x8e   :  { %3211 = shalt.err (!%p3208_p10)
}
  0x8f   :  { %s3212_s2 = scalar_lea.vmem %s128_s24, 2048  ;;  %p3217_p12 = scmp.lt.s32.totalorder %s128_s24, %s128_s24 }
  0x90   :  { %p3213_p11 = scmp.ne.s32.totalorder %s128_s24, %s3212_s2  ;;  %p3218_p13 = scmp.lt.s32.totalorder %s3212_s2, %s3212_s2 }
  0x92   :  { %p3219_p0 = por %p3218_p13, %p3217_p12 }
  0x94   :  { %p3220_p1 = pnand %p3219_p0, %p3213_p11 }
  0x96   :  { %3223 = shalt.err (!%p3220_p1)
}
  0x97   :  { %133 = dma.hbm_to_vmem [thread:$0]  %s3856_s8, 2048, %s128_s24, [#allocation16], %s3318_s15, %s3318_s15, %s3319_s16  }
  0x98   :  { %3300 = dma.done.wait [#allocation3], 2048  }
  0x99   :  { %3301 = vsyncadd [#allocation3], 4294965248 }
  0x9a   :  { %3302 = dma.done.wait [#allocation7], 4096  }
  0x9b   :  { %3303 = vsyncadd [#allocation7], 4294963200 }
  0x9c   :  { %3304 = dma.done.wait [#allocation10], 4096  }
  0x9d   :  { %3305 = vsyncadd [#allocation10], 4294963200 }
  0x9e   :  { %3306 = dma.done.wait [#allocation13], 4096  }
  0x9f   :  { %3307 = vsyncadd [#allocation13], 4294963200 }
  0xa0   :  { %3308 = dma.done.wait [#allocation16], 4096  }
  0xa1   :  { %3309 = vsyncadd [#allocation16], 4294963200  ;;  %v3327_v0 = vmov 0.0|0.0   ;;  %vm3328_vm0 = vmmov 0   ;;  %v3329_v1 = vmov 0.0   ;;  %v193_v2 = vld [vmem:[#allocation8] sm:$0xff] }
  0xa2   :  { %2825 = vmatprep.subr.bf16.mxu0 %v3327_v0  ;;  %2584 = vmatprep.mubr.msk.f32.mxu0 %vm3328_vm0, %v3329_v1  ;;  %v194_v3 = vld [vmem:[#allocation8 + $0x8] sm:$0xff]  ;;  %v195_v4 = vld [vmem:[#allocation8 + $0x10] sm:$0xff]  ;;  %v257_v6 = vmul.f32 %v193_v2, %v193_v2  ;;  %v196_v8 = vld [vmem:[#allocation8 + $0x18] sm:$0xff]  ;;  %s3331_s8 = smov [#allocation19]   ;;  %s3332_s16 = smov [#allocation18]  }
  0xa3   :  { %v2849_v5 = vpack.c.bf16 %v194_v3, %v193_v2  ;;  %v258_v7 = vmul.f32 %v194_v3, %v194_v3  ;;  %v2853_v9 = vpack.c.bf16 %v196_v8, %v195_v4  ;;  %v259_v11 = vmul.f32 %v195_v4, %v195_v4  ;;  %v177_v13 = vld [vmem:[#allocation6] sm:$0xff]  ;;  %v198_v15 = vld [vmem:[#allocation8 + $0x28] sm:$0xff]  ;;  %v199_v20 = vld [vmem:[#allocation8 + $0x30] sm:$0xff]  ;;  %s2120_s15 = sshll.u32 %s3331_s8, 4  ;;  %s2108_s23 = sshll.u32 %s3332_s16, 4  ;;  %s2121_s15 = int_to_ptr.vmem [resolvable:$true] %s2120_s15  ;;  %s3784_s23 = int_to_ptr.vmem [resolvable:$true] %s2108_s23 }
  0xa4   :  { %v260_v12 = vmul.f32 %v196_v8, %v196_v8  ;;  %v197_v14 = vld [vmem:[#allocation8 + $0x20] sm:$0xff]  ;;  %2619 = vmatprep.mubr.f32.mxu1 %v177_v13  ;;  %v262_v19 = vmul.f32 %v198_v15, %v198_v15  ;;  %v200_v21 = vld [vmem:[#allocation8 + $0x38] sm:$0xff]  ;;  %v209_v24 = vmul.f32 %v177_v13, %v177_v13  ;;  %v3570_v25 = vld [vmem:[#allocation6 + $0x8] sm:$0xff]  ;;  %v263_v27 = vmul.f32 %v199_v20, %v199_v20  ;;  %s3224_s13 = scalar_lea.vmem %s2121_s15, 1024  ;;  %p3229_p3 = scmp.lt.s32.totalorder %s2121_s15, %s2121_s15 }
  0xa5   :  { %2850 = vmatprep.subr.bf16.mxu1 %v2849_v5  ;;  %v2826_v10 = vpack.c.bf16 %v258_v7, %v257_v6  ;;  %v2857_v17 = vpack.c.bf16 %v198_v15, %v197_v14  ;;  %v261_v18 = vmul.f32 %v197_v14, %v197_v14  ;;  %v2861_v23 = vpack.c.bf16 %v200_v21, %v199_v20  ;;  %v201_v29 = vld [vmem:[#allocation8 + $0x40] sm:$0xff]  ;;  %v202_v30 = vld [vmem:[#allocation8 + $0x48] sm:$0xff]  ;;  %v203_v35 = vld [vmem:[#allocation8 + $0x50] sm:$0xff]  ;;  %p3225_p2 = scmp.ne.s32.totalorder %s2121_s15, %s3224_s13  ;;  %p3230_p4 = scmp.lt.s32.totalorder %s3224_s13, %s3224_s13 }
  0xa6   :  { %2852 = vmatpush3.bf16.xpose.msra.mxu1 %v2849_v5  ;;  %v2829_v16 = vpack.c.bf16 %v260_v12, %v259_v11  ;;  %225 = vadd.xlane.f32.xlu1 %v209_v24  ;;  %v210_v26 = vmul.f32 %v3570_v25, %v3570_v25  ;;  %v264_v28 = vmul.f32 %v200_v21, %v200_v21  ;;  %v204_v36 = vld [vmem:[#allocation8 + $0x58] sm:$0xff]  ;;  %v205_v41 = vld [vmem:[#allocation8 + $0x60] sm:$0xff]  ;;  %v206_v42 = vld [vmem:[#allocation8 + $0x68] sm:$0xff]  ;;  %v3330_v3 = vmov 1.0  }
  0xa7   :  { %2827 = vmatpush3.bf16.xpose.msra.mxu0 %v2826_v10  ;;  %2854 = vmatprep.subr.bf16.mxu1 %v2853_v9  ;;  %v2832_v22 = vpack.c.bf16 %v262_v19, %v261_v18  ;;  %v2865_v32 = vpack.c.bf16 %v202_v30, %v201_v29  ;;  %v265_v33 = vmul.f32 %v201_v29, %v201_v29  ;;  %v207_v47 = vld [vmem:[#allocation8 + $0x70] sm:$0xff]  ;;  %v208_v48 = vld [vmem:[#allocation8 + $0x78] sm:$0xff]  ;;  %v858_v53 = vld [vmem:[#allocation12] sm:$0xff]  ;;  %p3231_p5 = por %p3230_p4, %p3229_p3 }
  0xa8   :  { %2828 = vmatprep.subr.bf16.mxu0 %v3327_v0  ;;  %v2835_v31 = vpack.c.bf16 %v264_v28, %v263_v27  ;;  %v266_v34 = vmul.f32 %v202_v30, %v202_v30  ;;  %v2869_v38 = vpack.c.bf16 %v204_v36, %v203_v35  ;;  %v267_v39 = vmul.f32 %v203_v35, %v203_v35  ;;  %v859_v54 = vld [vmem:[#allocation12 + $0x8] sm:$0xff]  ;;  %v860_v59 = vld [vmem:[#allocation12 + $0x10] sm:$0xff]  ;;  %v861_v60 = vld [vmem:[#allocation12 + $0x18] sm:$0xff] }
  0xa9   :  { %v268_v40 = vmul.f32 %v204_v36, %v204_v36  ;;  %v2873_v44 = vpack.c.bf16 %v206_v42, %v205_v41  ;;  %v269_v45 = vmul.f32 %v205_v41, %v205_v41  ;;  %v270_v46 = vmul.f32 %v206_v42, %v206_v42  ;;  %v179_v63 = vld [vmem:[#allocation6 + $0x10] sm:$0xff]  ;;  %v3581_v2 = vld [vmem:[#allocation11] sm:$0xff]  ;;  %v180_v4 = vld [vmem:[#allocation6 + $0x18] sm:$0xff]  ;;  %p3232_p6 = pnand %p3231_p5, %p3225_p2 }
  0xaa   :  { %227 = vadd.xlane.f32.xlu1 %v210_v26  ;;  %v2838_v37 = vpack.c.bf16 %v266_v34, %v265_v33  ;;  %v2877_v50 = vpack.c.bf16 %v208_v48, %v207_v47  ;;  %v271_v51 = vmul.f32 %v207_v47, %v207_v47  ;;  %v272_v52 = vmul.f32 %v208_v48, %v208_v48  ;;  %v181_v8 = vld [vmem:[#allocation6 + $0x20] sm:$0xff]  ;;  %v863_v10 = vld [vmem:[#allocation12 + $0x28] sm:$0xff]  ;;  %v3587_v11 = vld [vmem:[#allocation11 + $0x18] sm:$0xff] }
  0xab   :  { %v2841_v43 = vpack.c.bf16 %v268_v40, %v267_v39  ;;  %v2844_v49 = vpack.c.bf16 %v270_v46, %v269_v45  ;;  %v2905_v56 = vpack.c.bf16 %v859_v54, %v858_v53  ;;  %v922_v57 = vmul.f32 %v858_v53, %v858_v53  ;;  %v182_v13 = vld [vmem:[#allocation6 + $0x28] sm:$0xff]  ;;  %v184_v21 = vld [vmem:[#allocation6 + $0x38] sm:$0xff]  ;;  %v185_v24 = vld [vmem:[#allocation6 + $0x40] sm:$0xff] }
  0xac   :  { %v2847_v55 = vpack.c.bf16 %v272_v52, %v271_v51  ;;  %v923_v58 = vmul.f32 %v859_v54, %v859_v54  ;;  %v2909_v62 = vpack.c.bf16 %v861_v60, %v860_v59  ;;  %v874_v5 = vmul.f32 %v3581_v2, %v3581_v2  ;;  %v3595_v18 = vld [vmem:[#allocation15 + $0x8] sm:$0xff]  ;;  %v864_v26 = vld [vmem:[#allocation12 + $0x30] sm:$0xff]  ;;  %v865_v27 = vld [vmem:[#allocation12 + $0x38] sm:$0xff] }
  0xad   :  { %v924_v6 = vmul.f32 %v860_v59, %v860_v59  ;;  %v925_v7 = vmul.f32 %v861_v60, %v861_v60  ;;  %v877_v12 = vmul.f32 %v3587_v11, %v3587_v11  ;;  %v1520_v20 = vmul.f32 %v3595_v18, %v3595_v18  ;;  %v3604_v28 = vld [vmem:[#allocation15 + $0x18] sm:$0xff]  ;;  %v187_v34 = vld [vmem:[#allocation6 + $0x50] sm:$0xff]  ;;  %v3610_v35 = vld [vmem:[#allocation15] sm:$0xff] }
  0xae   :  { %2856 = vmatpush3.bf16.xpose.msra.mxu1 %v2853_v9  ;;  %v2882_v61 = vpack.c.bf16 %v923_v58, %v922_v57  ;;  %v862_v9 = vld [vmem:[#allocation12 + $0x20] sm:$0xff]  ;;  %890 = vadd.xlane.f32.xlu0 %v874_v5  ;;  %v1522_v30 = vmul.f32 %v3604_v28, %v3604_v28  ;;  %v2917_v33 = vpack.c.bf16 %v865_v27, %v864_v26  ;;  %v3614_v41 = vld [vmem:[#allocation15 + $0x10] sm:$0xff]  ;;  %v190_v45 = vld [vmem:[#allocation6 + $0x68] sm:$0xff] }
  0xaf   :  { %2830 = vmatpush3.bf16.xpose.msra.mxu0 %v2829_v16  ;;  %2858 = vmatprep.subr.bf16.mxu1 %v2857_v17  ;;  %v2885_v14 = vpack.c.bf16 %v925_v7, %v924_v6  ;;  %v2913_v15 = vpack.c.bf16 %v863_v10, %v862_v9  ;;  %v183_v16 = vld [vmem:[#allocation6 + $0x30] sm:$0xff]  ;;  %v1519_v36 = vmul.f32 %v3610_v35, %v3610_v35  ;;  %v189_v40 = vld [vmem:[#allocation6 + $0x60] sm:$0xff]  ;;  %v869_v53 = vld [vmem:[#allocation12 + $0x58] sm:$0xff] }
  0xb0   :  { %2831 = vmatprep.subr.bf16.mxu0 %v3327_v0  ;;  %896 = vadd.xlane.f32.xlu1 %v877_v12  ;;  %v929_v39 = vmul.f32 %v865_v27, %v865_v27  ;;  %v866_v42 = vld [vmem:[#allocation12 + $0x40] sm:$0xff]  ;;  %v191_v48 = vld [vmem:[#allocation6 + $0x70] sm:$0xff]  ;;  %v933_v57 = vmul.f32 %v869_v53, %v869_v53  ;;  %v871_v59 = vld [vmem:[#allocation12 + $0x68] sm:$0xff] }
  0xb1   :  { %v868_v52 = vld [vmem:[#allocation12 + $0x50] sm:$0xff]  ;;  %v870_v58 = vld [vmem:[#allocation12 + $0x60] sm:$0xff]  ;;  %v1508_v27 = vld [vmem:[#allocation17 + $0x28] sm:$0xff] }
  0xb4   :  { %1537 = vadd.xlane.f32.xlu1 %v1520_v20 }
  0xb6   :  { %2860 = vmatpush3.bf16.xpose.msra.mxu1 %v2857_v17  ;;  %v3593_v17 = vld [vmem:[#allocation11 + $0x8] sm:$0xff] }
  0xb7   :  { %2833 = vmatpush3.bf16.xpose.msra.mxu0 %v2832_v22  ;;  %2862 = vmatprep.subr.bf16.mxu1 %v2861_v23  ;;  %v875_v19 = vmul.f32 %v3593_v17, %v3593_v17  ;;  %v926_v22 = vmul.f32 %v862_v9, %v862_v9  ;;  %v1503_v9 = vld [vmem:[#allocation17] sm:$0xff] }
  0xb8   :  { %2834 = vmatprep.subr.bf16.mxu0 %v3327_v0  ;;  %1541 = vadd.xlane.f32.xlu1 %v1522_v30  ;;  %v3631_v30 = vld [vmem:[#allocation2 + $0x8] sm:$0xff] }
  0xb9   :  { %892 = vadd.xlane.f32.xlu0 %v875_v19  ;;  %v1506_v19 = vld [vmem:[#allocation17 + $0x18] sm:$0xff] }
  0xbe   :  { %2864 = vmatpush3.bf16.xpose.msra.mxu1 %v2861_v23  ;;  %v927_v23 = vmul.f32 %v863_v10, %v863_v10  ;;  %v1504_v10 = vld [vmem:[#allocation17 + $0x8] sm:$0xff] }
  0xbf   :  { %2836 = vmatpush3.bf16.xpose.msra.mxu0 %v2835_v31  ;;  %2866 = vmatprep.subr.bf16.mxu1 %v2865_v32  ;;  %v186_v31 = vld [vmem:[#allocation6 + $0x48] sm:$0xff] }
  0xc0   :  { %2837 = vmatprep.subr.bf16.mxu0 %v3327_v0 }
  0xc6   :  { %2868 = vmatpush3.bf16.xpose.msra.mxu1 %v2865_v32  ;;  %v2888_v32 = vpack.c.bf16 %v927_v23, %v926_v22  ;;  %v1570_v23 = vmul.f32 %v1506_v19, %v1506_v19 }
  0xc7   :  { %2839 = vmatpush3.bf16.xpose.msra.mxu0 %v2838_v37  ;;  %2870 = vmatprep.subr.bf16.mxu1 %v2869_v38  ;;  %v188_v37 = vld [vmem:[#allocation6 + $0x58] sm:$0xff] }
  0xc8   :  { %2840 = vmatprep.subr.bf16.mxu0 %v3327_v0 }
  0xce   :  { %2872 = vmatpush3.bf16.xpose.msra.mxu1 %v2869_v38  ;;  %v928_v38 = vmul.f32 %v864_v26, %v864_v26  ;;  %v846_v26 = vld [vmem:[#allocation11 + $0x20] sm:$0xff] }
  0xcf   :  { %2842 = vmatpush3.bf16.xpose.msra.mxu0 %v2841_v43  ;;  %2874 = vmatprep.subr.bf16.mxu1 %v2873_v44  ;;  %v867_v43 = vld [vmem:[#allocation12 + $0x48] sm:$0xff] }
  0xd0   :  { %2843 = vmatprep.subr.bf16.mxu0 %v3327_v0  ;;  %v2891_v46 = vpack.c.bf16 %v929_v39, %v928_v38  ;;  %v2921_v47 = vpack.c.bf16 %v867_v43, %v866_v42  ;;  %v931_v51 = vmul.f32 %v867_v43, %v867_v43  ;;  %v3644_v38 = vld [vmem:[#allocation2 + $0x18] sm:$0xff]  ;;  %v3648_v43 = vld [vmem:[#allocation2 + $0x20] sm:$0xff] }
  0xd6   :  { %2876 = vmatpush3.bf16.xpose.msra.mxu1 %v2873_v44  ;;  %v1521_v44 = vmul.f32 %v3614_v41, %v3614_v41 }
  0xd7   :  { %2845 = vmatpush3.bf16.xpose.msra.mxu0 %v2844_v49  ;;  %2878 = vmatprep.subr.bf16.mxu1 %v2877_v50  ;;  %v192_v49 = vld [vmem:[#allocation6 + $0x78] sm:$0xff] }
  0xd8   :  { %2846 = vmatprep.subr.bf16.mxu0 %v3327_v0 }
  0xde   :  { %2880 = vmatpush3.bf16.xpose.msra.mxu1 %v2877_v50  ;;  %v930_v50 = vmul.f32 %v866_v42, %v866_v42  ;;  %v849_v42 = vld [vmem:[#allocation11 + $0x38] sm:$0xff] }
  0xdf   :  { %2848 = vmatpush3.bf16.xpose.msra.mxu0 %v2847_v55  ;;  %2906 = vmatprep.subr.bf16.mxu1 %v2905_v56  ;;  %v2925_v55 = vpack.c.bf16 %v869_v53, %v868_v52  ;;  %v851_v53 = vld [vmem:[#allocation11 + $0x48] sm:$0xff] }
  0xe0   :  { %2881 = vmatprep.subr.bf16.mxu0 %v3327_v0  ;;  %v2894_v54 = vpack.c.bf16 %v931_v51, %v930_v50  ;;  %v3653_v50 = vld [vmem:[#allocation2 + $0x28] sm:$0xff] }
  0xe1   :  { %v690_v51 = vmul.f32 %v3653_v50, %v3653_v50 }
  0xe5   :  { %2620 = vmatmul.mubr.f32.vlgmr.msra.gmra.mrb[0].mxu1 %v3570_v25  ;;  %v3601_v25 = vld [vmem:[#allocation11 + $0x10] sm:$0xff] }
  0xe6   :  { %2585 = vmatmul.mubr.f32.vlgmr.msra.gmra.mrb[0].mxu0 %v3330_v3  ;;  %2908 = vmatpush3.bf16.xpose.msra.mxu1 %v2905_v56  ;;  %v876_v29 = vmul.f32 %v3601_v25, %v3601_v25  ;;  %v932_v56 = vmul.f32 %v868_v52, %v868_v52 }
  0xe7   :  { %2883 = vmatpush3.bf16.xpose.msra.mxu0 %v2882_v61  ;;  %2910 = vmatprep.subr.bf16.mxu1 %v2909_v62  ;;  %v2929_v61 = vpack.c.bf16 %v871_v59, %v870_v58 }
  0xe8   :  { %2884 = vmatprep.subr.bf16.mxu0 %v3327_v0  ;;  %2622 = vmatprep.mubr.f32.mxu1 %v179_v63  ;;  %v2897_v60 = vpack.c.bf16 %v933_v57, %v932_v56  ;;  %v935_v63 = vmul.f32 %v871_v59, %v871_v59  ;;  %v852_v57 = vld [vmem:[#allocation11 + $0x50] sm:$0xff] }
  0xe9   :  { %2623 = vmatmul.mubr.f32.gmra.mrb[2].mxu1 %v180_v4  ;;  %2675 = vmatprep.mubr.msk.f32.mxu0 %vm3328_vm0, %v3329_v1  ;;  %v873_v4 = vld [vmem:[#allocation12 + $0x78] sm:$0xff] }
  0xea   :  { %2625 = vmatprep.mubr.f32.mxu1 %v181_v8  ;;  %894 = vadd.xlane.f32.xlu0 %v876_v29  ;;  %v937_v8 = vmul.f32 %v873_v4, %v873_v4  ;;  %v3629_v29 = vld [vmem:[#allocation2] sm:$0xff] }
  0xed   :  { %2626 = vmatmul.mubr.f32.gmra.mrb[4].mxu1 %v182_v13  ;;  %v2961_v13 = vpack.c.bf16 %v1504_v10, %v1503_v9 }
  0xee   :  { %2912 = vmatpush3.bf16.xpose.msra.mxu1 %v2909_v62  ;;  %2628 = vmatprep.mubr.f32.mxu1 %v183_v16  ;;  %v934_v62 = vmul.f32 %v870_v58, %v870_v58  ;;  %v1505_v16 = vld [vmem:[#allocation17 + $0x10] sm:$0xff] }
  0xef   :  { %2886 = vmatpush3.bf16.xpose.msra.mxu0 %v2885_v14  ;;  %2914 = vmatprep.subr.bf16.mxu1 %v2913_v15  ;;  %v1567_v14 = vmul.f32 %v1503_v9, %v1503_v9  ;;  %v1569_v22 = vmul.f32 %v1505_v16, %v1505_v16  ;;  %v1511_v9 = vld [vmem:[#allocation17 + $0x40] sm:$0xff] }
  0xf0   :  { %2887 = vmatprep.subr.bf16.mxu0 %v3327_v0  ;;  %1535 = vadd.xlane.f32.xlu0 %v1519_v36  ;;  %v2900_v5 = vpack.c.bf16 %v935_v63, %v934_v62  ;;  %v848_v36 = vld [vmem:[#allocation11 + $0x30] sm:$0xff] }
  0xf1   :  { %2629 = vmatmul.mubr.f32.gmra.mrb[6].mxu1 %v184_v21  ;;  %v2965_v21 = vpack.c.bf16 %v1506_v19, %v1505_v16  ;;  %v171_v16 = vld [vmem:[#allocation2 + $0x50] sm:$0xff] }
  0xf2   :  { %2631 = vmatprep.mubr.f32.mxu1 %v185_v24  ;;  %v1507_v24 = vld [vmem:[#allocation17 + $0x20] sm:$0xff] }
  0xf4   :  { %1539 = vadd.xlane.f32.xlu0 %v1521_v44  ;;  %v1572_v44 = vmul.f32 %v1508_v27, %v1508_v27 }
  0xf5   :  { %2632 = vmatmul.mubr.f32.gmra.mrb[8].mxu1 %v186_v31  ;;  %v847_v31 = vld [vmem:[#allocation11 + $0x28] sm:$0xff] }
  0xf6   :  { %2916 = vmatpush3.bf16.xpose.msra.mxu1 %v2913_v15  ;;  %2634 = vmatprep.mubr.f32.mxu1 %v187_v34  ;;  %v1568_v15 = vmul.f32 %v1504_v10, %v1504_v10  ;;  %v2969_v34 = vpack.c.bf16 %v1508_v27, %v1507_v24  ;;  %v1512_v10 = vld [vmem:[#allocation17 + $0x48] sm:$0xff] }
  0xf7   :  { %2889 = vmatpush3.bf16.xpose.msra.mxu0 %v2888_v32  ;;  %2918 = vmatprep.subr.bf16.mxu1 %v2917_v33  ;;  %v3640_v32 = vld [vmem:[#allocation2 + $0x10] sm:$0xff] }
  0xf8   :  { %2890 = vmatprep.subr.bf16.mxu0 %v3327_v0  ;;  %v2938_v20 = vpack.c.bf16 %v1568_v15, %v1567_v14  ;;  %v855_v15 = vld [vmem:[#allocation11 + $0x68] sm:$0xff] }
  0xf9   :  { %2635 = vmatmul.mubr.f32.gmra.mrb[10].mxu1 %v188_v37  ;;  %v687_v37 = vmul.f32 %v3640_v32, %v3640_v32 }
  0xfa   :  { %2637 = vmatprep.mubr.f32.mxu1 %v189_v40  ;;  %v1571_v40 = vmul.f32 %v1507_v24, %v1507_v24  ;;  %v172_v24 = vld [vmem:[#allocation2 + $0x58] sm:$0xff] }
  0xfd   :  { %2638 = vmatmul.mubr.f32.gmra.mrb[12].mxu1 %v190_v45  ;;  %v850_v45 = vld [vmem:[#allocation11 + $0x40] sm:$0xff] }
  0xfe   :  { %2920 = vmatpush3.bf16.xpose.msra.mxu1 %v2917_v33  ;;  %2640 = vmatprep.mubr.f32.mxu1 %v191_v48  ;;  %v2941_v33 = vpack.c.bf16 %v1570_v23, %v1569_v22  ;;  %v1509_v48 = vld [vmem:[#allocation17 + $0x30] sm:$0xff]  ;;  %v695_v22 = vmul.f32 %v171_v16, %v171_v16 }
  0xff   :  { %2892 = vmatpush3.bf16.xpose.msra.mxu0 %v2891_v46  ;;  %2922 = vmatprep.subr.bf16.mxu1 %v2921_v47  ;;  %v689_v46 = vmul.f32 %v3648_v43, %v3648_v43  ;;  %v1573_v63 = vmul.f32 %v1509_v48, %v1509_v48 }
 0x100   :  { %2893 = vmatprep.subr.bf16.mxu0 %v3327_v0 }
 0x101   :  { %2641 = vmatmul.mubr.f32.gmra.mrb[14].mxu1 %v192_v49  ;;  %v1510_v49 = vld [vmem:[#allocation17 + $0x38] sm:$0xff] }
 0x102   :  { %2710 = vmatprep.mubr.f32.mxu1 %v3581_v2  ;;  %v872_v2 = vld [vmem:[#allocation12 + $0x70] sm:$0xff]  ;;  %v2973_v56 = vpack.c.bf16 %v1510_v49, %v1509_v48 }
 0x103   :  { %v2933_v6 = vpack.c.bf16 %v873_v4, %v872_v2  ;;  %v936_v7 = vmul.f32 %v872_v2, %v872_v2  ;;  %v853_v2 = vld [vmem:[#allocation11 + $0x58] sm:$0xff]  ;;  %v3665_v4 = vld [vmem:[#allocation2 + $0x40] sm:$0xff] }
 0x105   :  { %v2903_v12 = vpack.c.bf16 %v937_v8, %v936_v7  ;;  %v693_v7 = vmul.f32 %v3665_v4, %v3665_v4 }
 0x106   :  { %2924 = vmatpush3.bf16.xpose.msra.mxu1 %v2921_v47 }
 0x107   :  { %2895 = vmatpush3.bf16.xpose.msra.mxu0 %v2894_v54  ;;  %2926 = vmatprep.subr.bf16.mxu1 %v2925_v55  ;;  %v3657_v54 = vld [vmem:[#allocation2 + $0x30] sm:$0xff] }
 0x108   :  { %2896 = vmatprep.subr.bf16.mxu0 %v3327_v0  ;;  %v691_v59 = vmul.f32 %v3657_v54, %v3657_v54 }
 0x10e   :  { %2928 = vmatpush3.bf16.xpose.msra.mxu1 %v2925_v55  ;;  %v2944_v55 = vpack.c.bf16 %v1572_v44, %v1571_v40 }
 0x10f   :  { %2898 = vmatpush3.bf16.xpose.msra.mxu0 %v2897_v60  ;;  %2930 = vmatprep.subr.bf16.mxu1 %v2929_v61  ;;  %v3661_v60 = vld [vmem:[#allocation2 + $0x38] sm:$0xff] }
 0x110   :  { %2899 = vmatprep.subr.bf16.mxu0 %v3327_v0 }
 0x116   :  { %2932 = vmatpush3.bf16.xpose.msra.mxu1 %v2929_v61  ;;  %v692_v61 = vmul.f32 %v3661_v60, %v3661_v60 }
 0x117   :  { %2901 = vmatpush3.bf16.xpose.msra.mxu0 %v2900_v5  ;;  %2934 = vmatprep.subr.bf16.mxu1 %v2933_v6  ;;  %v1574_v5 = vmul.f32 %v1510_v49, %v1510_v49 }
 0x118   :  { %2902 = vmatprep.subr.bf16.mxu0 %v3327_v0 }
 0x119   :  { %v2947_v19 = vpack.c.bf16 %v1574_v5, %v1573_v63  ;;  %v735_v63 = vmul.f32 0.0, %v3653_v50  ;;  %v737_v5 = vmul.f32 0.0, %v3661_v60 }
 0x11e   :  { %2936 = vmatpush3.bf16.xpose.msra.mxu1 %v2933_v6  ;;  %v854_v6 = vld [vmem:[#allocation11 + $0x60] sm:$0xff] }
 0x11f   :  { %2904 = vmatpush3.bf16.xpose.msra.mxu0 %v2903_v12  ;;  %2962 = vmatprep.subr.bf16.mxu1 %v2961_v13  ;;  %v170_v12 = vld [vmem:[#allocation2 + $0x48] sm:$0xff] }
 0x120   :  { %2937 = vmatprep.subr.bf16.mxu0 %v3327_v0 }
 0x125   :  { %2711 = vmatmul.mubr.f32.vlgmr.msra.gmra.mrb[16].mxu1 %v3593_v17  ;;  %v685_v17 = vmul.f32 %v3629_v29, %v3629_v29 }
 0x126   :  { %2676 = vmatmul.mubr.f32.vlgmr.msra.gmra.mrb[2].mxu0 %v3330_v3  ;;  %2964 = vmatpush3.bf16.xpose.msra.mxu1 %v2961_v13  ;;  %v694_v13 = vmul.f32 %v170_v12, %v170_v12 }
 0x127   :  { %2939 = vmatpush3.bf16.xpose.msra.mxu0 %v2938_v20  ;;  %2713 = vmatprep.mubr.f32.mxu1 %v3601_v25  ;;  %v686_v25 = vmul.f32 %v3631_v30, %v3631_v30  ;;  %v2977_v20 = vpack.c.bf16 %v1512_v10, %v1511_v9 }
 0x128   :  { %2966 = vmatprep.subr.bf16.mxu1 %v2965_v21  ;;  %2940 = vmatprep.subr.bf16.mxu0 %v3327_v0 }
 0x129   :  { %2714 = vmatmul.mubr.f32.gmra.mrb[18].mxu1 %v3587_v11  ;;  %2766 = vmatprep.mubr.msk.f32.mxu0 %vm3328_vm0, %v3329_v1  ;;  %v701_v11 = vadd.f32 %v686_v25, %v685_v17  ;;  %v688_v1 = vmul.f32 %v3644_v38, %v3644_v38  ;;  %v1575_v17 = vmul.f32 %v1511_v9, %v1511_v9  ;;  %v857_v25 = vld [vmem:[#allocation11 + $0x78] sm:$0xff] }
 0x12a   :  { %2716 = vmatprep.mubr.f32.mxu1 %v846_v26  ;;  %v696_v26 = vmul.f32 %v172_v24, %v172_v24 }
 0x12b   :  { %v702_v39 = vadd.f32 %v701_v11, %v687_v37  ;;  %v1513_v37 = vld [vmem:[#allocation17 + $0x50] sm:$0xff]  ;;  %v1514_v11 = vld [vmem:[#allocation17 + $0x58] sm:$0xff] }
 0x12c   :  { %v1577_v48 = vmul.f32 %v1513_v37, %v1513_v37  ;;  %v1578_v49 = vmul.f32 %v1514_v11, %v1514_v11 }
 0x12d   :  { %2717 = vmatmul.mubr.f32.gmra.mrb[20].mxu1 %v847_v31  ;;  %v703_v47 = vadd.f32 %v702_v39, %v688_v1  ;;  %v173_v31 = vld [vmem:[#allocation2 + $0x60] sm:$0xff]  ;;  %v174_v1 = vld [vmem:[#allocation2 + $0x68] sm:$0xff] }
 0x12e   :  { %2968 = vmatpush3.bf16.xpose.msra.mxu1 %v2965_v21  ;;  %2719 = vmatprep.mubr.f32.mxu1 %v848_v36  ;;  %v856_v21 = vld [vmem:[#allocation11 + $0x70] sm:$0xff]  ;;  %v698_v39 = vmul.f32 %v174_v1, %v174_v1 }
 0x12f   :  { %2942 = vmatpush3.bf16.xpose.msra.mxu0 %v2941_v33  ;;  %2970 = vmatprep.subr.bf16.mxu1 %v2969_v34  ;;  %v704_v52 = vadd.f32 %v703_v47, %v689_v46  ;;  %v1576_v33 = vmul.f32 %v1512_v10, %v1512_v10  ;;  %v740_v10 = vmul.f32 0.0, %v171_v16  ;;  %v1518_v16 = vld [vmem:[#allocation17 + $0x78] sm:$0xff] }
 0x130   :  { %2943 = vmatprep.subr.bf16.mxu0 %v3327_v0 }
 0x131   :  { %2720 = vmatmul.mubr.f32.gmra.mrb[22].mxu1 %v849_v42  ;;  %v705_v58 = vadd.f32 %v704_v52, %v690_v51  ;;  %v175_v42 = vld [vmem:[#allocation2 + $0x70] sm:$0xff]  ;;  %v2950_v44 = vpack.c.bf16 %v1576_v33, %v1575_v17  ;;  %v176_v51 = vld [vmem:[#allocation2 + $0x78] sm:$0xff]  ;;  %v1515_v52 = vld [vmem:[#allocation17 + $0x60] sm:$0xff] }
 0x132   :  { %2722 = vmatprep.mubr.f32.mxu1 %v850_v45  ;;  %v2981_v45 = vpack.c.bf16 %v1514_v11, %v1513_v37  ;;  %v699_v46 = vmul.f32 %v175_v42, %v175_v42  ;;  %v1579_v60 = vmul.f32 %v1515_v52, %v1515_v52  ;;  %v3688_v17 = vld [vmem:[#allocation9 + $0x8] sm:$0xff] }
 0x133   :  { %v706_v62 = vadd.f32 %v705_v58, %v691_v59  ;;  %v2953_v58 = vpack.c.bf16 %v1578_v49, %v1577_v48  ;;  %v732_v59 = vmul.f32 0.0, %v3640_v32  ;;  %v743_v32 = vmul.f32 0.0, %v174_v1  ;;  %v832_v1 = vld [vmem:[#allocation9 + $0x30] sm:$0xff]  ;;  %v834_v48 = vld [vmem:[#allocation9 + $0x40] sm:$0xff] }
 0x134   :  { %v1338_v49 = vmul.f32 %v834_v48, %v834_v48 }
 0x135   :  { %2723 = vmatmul.mubr.f32.gmra.mrb[24].mxu1 %v851_v53  ;;  %v707_v8 = vadd.f32 %v706_v62, %v692_v61  ;;  %v1516_v53 = vld [vmem:[#allocation17 + $0x68] sm:$0xff]  ;;  %v733_v61 = vmul.f32 0.0, %v3644_v38  ;;  %v734_v62 = vmul.f32 0.0, %v3648_v43  ;;  %v745_v38 = vmul.f32 0.0, %v176_v51 }
 0x136   :  { %2972 = vmatpush3.bf16.xpose.msra.mxu1 %v2969_v34  ;;  %2725 = vmatprep.mubr.f32.mxu1 %v852_v57  ;;  %v697_v34 = vmul.f32 %v173_v31, %v173_v31 }
 0x137   :  { %2945 = vmatpush3.bf16.xpose.msra.mxu0 %v2944_v55  ;;  %2974 = vmatprep.subr.bf16.mxu1 %v2973_v56  ;;  %v708_v14 = vadd.f32 %v707_v8, %v693_v7  ;;  %v700_v55 = vmul.f32 %v176_v51, %v176_v51  ;;  %v739_v7 = vmul.f32 0.0, %v170_v12  ;;  %v2272_v8 = vpack.c.bf16 %v733_v61, %v732_v59  ;;  %v1517_v12 = vld [vmem:[#allocation17 + $0x70] sm:$0xff] }
 0x138   :  { %2946 = vmatprep.subr.bf16.mxu0 %v3327_v0  ;;  %v2277_v9 = vpack.c.bf16 %v735_v63, %v734_v62  ;;  %v838_v62 = vld [vmem:[#allocation9 + $0x60] sm:$0xff] }
 0x139   :  { %2726 = vmatmul.mubr.f32.gmra.mrb[26].mxu1 %v853_v2  ;;  %v709_v23 = vadd.f32 %v708_v14, %v694_v13  ;;  %v736_v2 = vmul.f32 0.0, %v3657_v54  ;;  %v741_v13 = vmul.f32 0.0, %v172_v24  ;;  %v742_v14 = vmul.f32 0.0, %v173_v31  ;;  %2384 = vst [vmem:[#allocation18 + $0x8] sm:$0xff] %v2272_v8   ;;  %v3694_v31 = vld [vmem:[#allocation9 + $0x10] sm:$0xff] }
 0x13a   :  { %2728 = vmatprep.mubr.f32.mxu1 %v854_v6  ;;  %v738_v6 = vmul.f32 0.0, %v3665_v4  ;;  %2385 = vst [vmem:[#allocation18 + $0x10] sm:$0xff] %v2277_v9   ;;  %v1580_v4 = vmul.f32 %v1516_v53, %v1516_v53  ;;  %v1582_v24 = vmul.f32 %v1518_v16, %v1518_v16  ;;  %v1342_v63 = vmul.f32 %v838_v62, %v838_v62  ;;  %v840_v8 = vld [vmem:[#allocation9 + $0x70] sm:$0xff] }
 0x13b   :  { %v710_v27 = vadd.f32 %v709_v23, %v695_v22  ;;  %v2282_v43 = vpack.c.bf16 %v737_v5, %v736_v2  ;;  %v2297_v54 = vpack.c.bf16 %v743_v32, %v742_v14  ;;  %v2989_v22 = vpack.c.bf16 %v1518_v16, %v1517_v12  ;;  %v839_v5 = vld [vmem:[#allocation9 + $0x68] sm:$0xff] }
 0x13c   :  { %v2287_v50 = vpack.c.bf16 %v739_v7, %v738_v6  ;;  %v1581_v23 = vmul.f32 %v1517_v12, %v1517_v12  ;;  %v1343_v6 = vmul.f32 %v839_v5, %v839_v5  ;;  %v1344_v9 = vmul.f32 %v840_v8, %v840_v8 }
 0x13d   :  { %2729 = vmatmul.mubr.f32.gmra.mrb[28].mxu1 %v855_v15  ;;  %v711_v36 = vadd.f32 %v710_v27, %v696_v26  ;;  %v744_v15 = vmul.f32 0.0, %v175_v42  ;;  %2386 = vst [vmem:[#allocation18 + $0x18] sm:$0xff] %v2282_v43   ;;  %2389 = vst [vmem:[#allocation18 + $0x30] sm:$0xff] %v2297_v54   ;;  %v3686_v27 = vld [vmem:[#allocation9] sm:$0xff]  ;;  %v1336_v42 = vmul.f32 %v832_v1, %v832_v1  ;;  %v1383_v54 = vmul.f32 0.0, %v834_v48  ;;  %v226_v48 = vpop.xlane.xlu1 %225 }
 0x13e   :  { %2976 = vmatpush3.bf16.xpose.msra.mxu1 %v2973_v56  ;;  %2731 = vmatprep.mubr.f32.mxu1 %v856_v21  ;;  %2387 = vst [vmem:[#allocation18 + $0x20] sm:$0xff] %v2287_v50   ;;  %v2956_v21 = vpack.c.bf16 %v1580_v4, %v1579_v60  ;;  %v2959_v26 = vpack.c.bf16 %v1582_v24, %v1581_v23  ;;  %v1387_v16 = vmul.f32 0.0, %v838_v62 }
 0x13f   :  { %2948 = vmatpush3.bf16.xpose.msra.mxu0 %v2947_v19  ;;  %2978 = vmatprep.subr.bf16.mxu1 %v2977_v20  ;;  %v712_v40 = vadd.f32 %v711_v36, %v697_v34  ;;  %v2292_v19 = vpack.c.bf16 %v741_v13, %v740_v10  ;;  %v831_v36 = vld [vmem:[#allocation9 + $0x28] sm:$0xff]  ;;  %v841_v13 = vld [vmem:[#allocation9 + $0x78] sm:$0xff] }
 0x140   :  { %2949 = vmatprep.subr.bf16.mxu0 %v3327_v0  ;;  %v1380_v32 = vmul.f32 0.0, %v831_v36  ;;  %v1390_v23 = vmul.f32 0.0, %v841_v13 }
 0x141   :  { %2732 = vmatmul.mubr.f32.gmra.mrb[30].mxu1 %v857_v25  ;;  %v713_v47 = vadd.f32 %v712_v40, %v698_v39  ;;  %2388 = vst [vmem:[#allocation18 + $0x28] sm:$0xff] %v2292_v19   ;;  %v1330_v25 = vmul.f32 %v3686_v27, %v3686_v27  ;;  %v1335_v39 = vmul.f32 %v831_v36, %v831_v36  ;;  %v3710_v36 = vld [vmem:[#allocation14 + $0x10] sm:$0xff] }
 0x142   :  { %2801 = vmatprep.mubr.f32.mxu1 %v3610_v35  ;;  %v2985_v35 = vpack.c.bf16 %v1516_v53, %v1515_v52  ;;  %v835_v52 = vld [vmem:[#allocation9 + $0x48] sm:$0xff] }
 0x143   :  { %v714_v56 = vadd.f32 %v713_v47, %v699_v46  ;;  %v1339_v53 = vmul.f32 %v835_v52, %v835_v52 }
 0x145   :  { %v715_v57 = vadd.f32 %v714_v56, %v700_v55  ;;  %v836_v56 = vld [vmem:[#allocation9 + $0x50] sm:$0xff] }
 0x146   :  { %2980 = vmatpush3.bf16.xpose.msra.mxu1 %v2977_v20  ;;  %v2302_v20 = vpack.c.bf16 %v745_v38, %v744_v15  ;;  %v1381_v15 = vmul.f32 0.0, %v832_v1  ;;  %v1345_v38 = vmul.f32 %v841_v13, %v841_v13  ;;  %v1385_v4 = vmul.f32 0.0, %v836_v56  ;;  %v3714_v1 = vld [vmem:[#allocation14 + $0x18] sm:$0xff] }
 0x147   :  { %2951 = vmatpush3.bf16.xpose.msra.mxu0 %v2950_v44  ;;  %2982 = vmatprep.subr.bf16.mxu1 %v2981_v45 }
 0x148   :  { %2952 = vmatprep.subr.bf16.mxu0 %v3327_v0  ;;  %716 = vadd.xlane.f32.xlu1 %v715_v57  ;;  %2390 = vst [vmem:[#allocation18 + $0x38] sm:$0xff] %v2302_v20   ;;  %v1340_v57 = vmul.f32 %v836_v56, %v836_v56  ;;  %v1384_v20 = vmul.f32 0.0, %v835_v52 }
 0x14e   :  { %2984 = vmatpush3.bf16.xpose.msra.mxu1 %v2981_v45  ;;  %v833_v45 = vld [vmem:[#allocation9 + $0x38] sm:$0xff] }
 0x14f   :  { %2954 = vmatpush3.bf16.xpose.msra.mxu0 %v2953_v58  ;;  %2986 = vmatprep.subr.bf16.mxu1 %v2985_v35  ;;  %v1337_v47 = vmul.f32 %v833_v45, %v833_v45  ;;  %v1382_v19 = vmul.f32 0.0, %v833_v45 }
 0x150   :  { %2955 = vmatprep.subr.bf16.mxu0 %v3327_v0 }
 0x151   :  { %v2322_v24 = vpack.c.bf16 %v1382_v19, %v1381_v15 }
 0x153   :  { %2393 = vst [vmem:[#allocation19 + $0x18] sm:$0xff] %v2322_v24  }
 0x156   :  { %2988 = vmatpush3.bf16.xpose.msra.mxu1 %v2985_v35  ;;  %v837_v35 = vld [vmem:[#allocation9 + $0x58] sm:$0xff] }
 0x157   :  { %2957 = vmatpush3.bf16.xpose.msra.mxu0 %v2956_v21  ;;  %2990 = vmatprep.subr.bf16.mxu1 %v2989_v22  ;;  %v1341_v59 = vmul.f32 %v837_v35, %v837_v35  ;;  %v1386_v12 = vmul.f32 0.0, %v837_v35  ;;  %v1388_v21 = vmul.f32 0.0, %v839_v5 }
 0x158   :  { %2958 = vmatprep.subr.bf16.mxu0 %v3327_v0  ;;  %v1331_v0 = vmul.f32 %v3688_v17, %v3688_v17 }
 0x15a   :  { %v1346_v33 = vadd.f32 %v1331_v0, %v1330_v25  ;;  %v2332_v25 = vpack.c.bf16 %v1386_v12, %v1385_v4  ;;  %v2337_v0 = vpack.c.bf16 %v1388_v21, %v1387_v16 }
 0x15c   :  { %2395 = vst [vmem:[#allocation19 + $0x28] sm:$0xff] %v2332_v25   ;;  %2396 = vst [vmem:[#allocation19 + $0x30] sm:$0xff] %v2337_v0  }
 0x15e   :  { %2992 = vmatpush3.bf16.xpose.msra.mxu1 %v2989_v22  ;;  %v1389_v22 = vmul.f32 0.0, %v840_v8 }
 0x15f   :  { %2960 = vmatpush3.bf16.xpose.msra.mxu0 %v2959_v26  ;;  %v2327_v26 = vpack.c.bf16 %v1384_v20, %v1383_v54 }
 0x161   :  { %2394 = vst [vmem:[#allocation19 + $0x20] sm:$0xff] %v2327_v26  }
 0x165   :  { %2802 = vmatmul.mubr.f32.vlgmr.msra.gmra.mrb[32].mxu1 %v3595_v18  ;;  %v3698_v18 = vld [vmem:[#allocation9 + $0x18] sm:$0xff] }
 0x166   :  { %2767 = vmatmul.mubr.f32.vlgmr.msra.gmra.mrb[4].mxu0 %v3330_v3  ;;  %2804 = vmatprep.mubr.f32.mxu1 %v3614_v41  ;;  %v1332_v3 = vmul.f32 %v3694_v31, %v3694_v31  ;;  %v1333_v34 = vmul.f32 %v3698_v18, %v3698_v18 }
 0x168   :  { %v1347_v41 = vadd.f32 %v1346_v33, %v1332_v3  ;;  %v2342_v33 = vpack.c.bf16 %v1390_v23, %v1389_v22  ;;  %v3702_v3 = vld [vmem:[#allocation14] sm:$0xff]  ;;  %v1494_v22 = vld [vmem:[#allocation15 + $0x38] sm:$0xff] }
 0x169   :  { %2805 = vmatmul.mubr.f32.gmra.mrb[34].mxu1 %v3604_v28  ;;  %v830_v28 = vld [vmem:[#allocation9 + $0x20] sm:$0xff]  ;;  %v1482_v23 = vld [vmem:[#allocation14 + $0x58] sm:$0xff] }
 0x16a   :  { %v1334_v37 = vmul.f32 %v830_v28, %v830_v28  ;;  %v1348_v11 = vadd.f32 %v1347_v41, %v1333_v34  ;;  %v1379_v14 = vmul.f32 0.0, %v830_v28  ;;  %2397 = vst [vmem:[#allocation19 + $0x38] sm:$0xff] %v2342_v33   ;;  %v3704_v41 = vld [vmem:[#allocation14 + $0x8] sm:$0xff]  ;;  %v1960_v28 = vmul.f32 %v3702_v3, %v3702_v3  ;;  %v1483_v33 = vld [vmem:[#allocation14 + $0x60] sm:$0xff] }
 0x16b   :  { %v1961_v34 = vmul.f32 %v3704_v41, %v3704_v41  ;;  %v1971_v25 = vmul.f32 %v1482_v23, %v1482_v23 }
 0x16c   :  { %v1349_v40 = vadd.f32 %v1348_v11, %v1334_v37  ;;  %v2317_v50 = vpack.c.bf16 %v1380_v32, %v1379_v14  ;;  %v1962_v11 = vmul.f32 %v3710_v36, %v3710_v36 }
 0x16d   :  { %v1976_v37 = vadd.f32 %v1961_v34, %v1960_v28 }
 0x16e   :  { %v1350_v44 = vadd.f32 %v1349_v40, %v1335_v39  ;;  %2392 = vst [vmem:[#allocation19 + $0x10] sm:$0xff] %v2317_v50   ;;  %v488_v39 = vlaneseq  ;;  %v1963_v40 = vmul.f32 %v3714_v1, %v3714_v1  ;;  %v3745_v50 = vld [vmem:[#allocation14 + $0x50] sm:$0xff] }
 0x16f   :  { %v1970_v4 = vmul.f32 %v3745_v50, %v3745_v50 }
 0x170   :  { %v1351_v46 = vadd.f32 %v1350_v44, %v1336_v42  ;;  %v1977_v42 = vadd.f32 %v1976_v37, %v1962_v11  ;;  %v3718_v44 = vld [vmem:[#allocation14 + $0x20] sm:$0xff]  ;;  %v3749_v16 = vand.u32 127, %v488_v39 }
 0x171   :  { %v1964_v45 = vmul.f32 %v3718_v44, %v3718_v44  ;;  %v1495_v11 = vld [vmem:[#allocation15 + $0x40] sm:$0xff] }
 0x172   :  { %v1352_v51 = vadd.f32 %v1351_v46, %v1337_v47  ;;  %v1978_v46 = vadd.f32 %v1977_v42, %v1963_v40  ;;  %v3722_v47 = vld [vmem:[#allocation14 + $0x28] sm:$0xff]  ;;  %v1972_v40 = vmul.f32 %v1483_v33, %v1483_v33  ;;  %vm607_vm1 = vcmp.lt.s32.totalorder %v3749_v16, 32 }
 0x173   :  { %vm1882_vm2 = vcmp.lt.s32.totalorder %v3749_v16, 16 }
 0x174   :  { %v1353_v55 = vadd.f32 %v1352_v51, %v1338_v49  ;;  %v489_v49 = vshrl.u32 %v488_v39, 7  ;;  %v1965_v51 = vmul.f32 %v3722_v47, %v3722_v47  ;;  %v1979_v52 = vadd.f32 %v1978_v46, %v1964_v45  ;;  %v1496_v45 = vld [vmem:[#allocation15 + $0x48] sm:$0xff] }
 0x175   :  { %v1484_v46 = vld [vmem:[#allocation14 + $0x68] sm:$0xff] }
 0x176   :  { %v1354_v58 = vadd.f32 %v1353_v55, %v1339_v53  ;;  %v3726_v53 = vld [vmem:[#allocation14 + $0x30] sm:$0xff]  ;;  %v1980_v56 = vadd.f32 %v1979_v52, %v1965_v51  ;;  %v1973_v51 = vmul.f32 %v1484_v46, %v1484_v46 }
 0x177   :  { %v1966_v55 = vmul.f32 %v3726_v53, %v3726_v53  ;;  %v1485_v52 = vld [vmem:[#allocation14 + $0x70] sm:$0xff] }
 0x178   :  { %v1355_v61 = vadd.f32 %v1354_v58, %v1340_v57  ;;  %v3730_v57 = vld [vmem:[#allocation14 + $0x38] sm:$0xff]  ;;  %v3732_v58 = vsub.s32 0, %v489_v49 }
 0x179   :  { %v1981_v35 = vadd.f32 %v1980_v56, %v1966_v55 }
 0x17a   :  { %v1356_v2 = vadd.f32 %v1355_v61, %v1341_v59  ;;  %v1967_v59 = vmul.f32 %v3730_v57, %v3730_v57  ;;  %v3736_v61 = vld [vmem:[#allocation14 + $0x40] sm:$0xff] }
 0x17b   :  { %v1968_v5 = vmul.f32 %v3736_v61, %v3736_v61 }
 0x17c   :  { %v1357_v7 = vadd.f32 %v1356_v2, %v1342_v63  ;;  %v228_v63 = vpop.xlane.xlu1 %227  ;;  %v1491_v2 = vld [vmem:[#allocation15 + $0x20] sm:$0xff] }
 0x17d   :  { %2807 = vmatprep.mubr.f32.mxu1 %v1491_v2 }
 0x17e   :  { %v1358_v10 = vadd.f32 %v1357_v7, %v1343_v6  ;;  %v1982_v6 = vadd.f32 %v1981_v35, %v1967_v59 }
 0x180   :  { %v1359_v43 = vadd.f32 %v1358_v10, %v1344_v9  ;;  %v1492_v9 = vld [vmem:[#allocation15 + $0x28] sm:$0xff]  ;;  %v1983_v15 = vadd.f32 %v1982_v6, %v1968_v5 }
 0x181   :  { %v3740_v10 = vld [vmem:[#allocation14 + $0x48] sm:$0xff]  ;;  %2808 = vmatmul.mubr.f32.gmra.mrb[36].mxu1 %v1492_v9  ;;  %v1498_v9 = vld [vmem:[#allocation15 + $0x58] sm:$0xff] }
 0x182   :  { %v1360_v60 = vadd.f32 %v1359_v43, %v1345_v38  ;;  %v1969_v32 = vmul.f32 %v3740_v10, %v3740_v10 }
 0x184   :  { %1361 = vadd.xlane.f32.xlu1 %v1360_v60  ;;  %v1493_v60 = vld [vmem:[#allocation15 + $0x30] sm:$0xff]  ;;  %v1984_v12 = vadd.f32 %v1983_v15, %v1969_v32 }
 0x185   :  { %2810 = vmatprep.mubr.f32.mxu1 %v1493_v60  ;;  %v2009_v60 = vmul.f32 0.0, %v3718_v44  ;;  %v2017_v44 = vmul.f32 0.0, %v1483_v33 }
 0x186   :  { %2811 = vmatmul.mubr.f32.gmra.mrb[38].mxu1 %v1494_v22  ;;  %v1985_v0 = vadd.f32 %v1984_v12, %v1970_v4  ;;  %v1500_v4 = vld [vmem:[#allocation15 + $0x68] sm:$0xff]  ;;  %v2012_v12 = vmul.f32 0.0, %v3730_v57  ;;  %v2013_v22 = vmul.f32 0.0, %v3736_v61 }
 0x187   :  { %2813 = vmatprep.mubr.f32.mxu1 %v1495_v11 }
 0x188   :  { %v1986_v42 = vadd.f32 %v1985_v0, %v1971_v25  ;;  %v1501_v25 = vld [vmem:[#allocation15 + $0x70] sm:$0xff] }
 0x18a   :  { %2814 = vmatmul.mubr.f32.gmra.mrb[40].mxu1 %v1496_v45  ;;  %v1987_v55 = vadd.f32 %v1986_v42, %v1972_v40 }
 0x18c   :  { %v1988_v32 = vadd.f32 %v1987_v55, %v1973_v51 }
 0x1b8   :  { %v2621_v62 = vpop.f32.mrb[0].mxu1 }
 0x1b9   :  { %v339_v7 = vpop.f32.mrb[0].mxu0  ;;  %v409_v8 = vpop.f32.mrb[1].mxu1  ;;  %v509_v38 = vmul.f32 2.0, %v2621_v62  ;;  %v1497_v62 = vld [vmem:[#allocation15 + $0x50] sm:$0xff] }
 0x1ba   :  { %v491_v13 = vrot.slane %v339_v7, %v3732_v58  ;;  %v2586_v14 = vpop.f32.mrb[1].mxu0  ;;  %v508_v43 = vmul.f32 2.0, %v409_v8  ;;  %2816 = vmatprep.mubr.f32.mxu1 %v1497_v62 }
 0x1bb   :  { %2817 = vmatmul.mubr.f32.gmra.mrb[42].mxu1 %v1498_v9 }
 0x1bc   :  { %v492_v19 = vadd.f32 %v491_v13, %v226_v48  ;;  %v493_v54 = vadd.f32 %v491_v13, %v228_v63  ;;  %v2624_v20 = vpop.f32.mrb[2].mxu1  ;;  %v1974_v63 = vmul.f32 %v1485_v52, %v1485_v52  ;;  %v1486_v13 = vld [vmem:[#allocation14 + $0x78] sm:$0xff] }
 0x1bd   :  { %v419_v21 = vpop.f32.mrb[3].mxu1  ;;  %v1975_v14 = vmul.f32 %v1486_v13, %v1486_v13  ;;  %v2020_v11 = vmul.f32 0.0, %v1486_v13 }
 0x1be   :  { %v524_v24 = vsub.f32 %v492_v19, %v508_v43  ;;  %v525_v26 = vsub.f32 %v493_v54, %v509_v38  ;;  %v1499_v19 = vld [vmem:[#allocation15 + $0x60] sm:$0xff]  ;;  %v1989_v54 = vadd.f32 %v1988_v32, %v1974_v63 }
 0x1bf   :  { %2819 = vmatprep.mubr.f32.mxu1 %v1499_v19 }
 0x1c0   :  { %v540_v28 = vsub.f32 1.0, %v524_v24  ;;  %v541_v34 = vsub.f32 1.0, %v525_v26  ;;  %v2627_v37 = vpop.f32.mrb[4].mxu1  ;;  %2820 = vmatmul.mubr.f32.gmra.mrb[44].mxu1 %v1500_v4  ;;  %v1990_v21 = vadd.f32 %v1989_v54, %v1975_v14  ;;  %v2014_v24 = vmul.f32 0.0, %v3740_v10 }
 0x1c1   :  { %v429_v39 = vpop.f32.mrb[5].mxu1  ;;  %v2015_v26 = vmul.f32 0.0, %v3745_v50  ;;  %2822 = vmatprep.mubr.f32.mxu1 %v1501_v25  ;;  %v2019_v37 = vmul.f32 0.0, %v1485_v52 }
 0x1c2   :  { %v556_v48 = vmax.f32 %v540_v28, 0.0  ;;  %v557_v49 = vmax.f32 %v541_v34, 0.0  ;;  %v2016_v28 = vmul.f32 0.0, %v1482_v23  ;;  %v2018_v34 = vmul.f32 0.0, %v1484_v46  ;;  %1991 = vadd.xlane.f32.xlu1 %v1990_v21  ;;  %v891_v46 = vpop.xlane.xlu0 %890 }
 0x1c3   :  { %v2367_v57 = vpack.c.bf16 %v2014_v24, %v2013_v22  ;;  %v2382_v10 = vpack.c.bf16 %v2020_v11, %v2019_v37 }
 0x1c4   :  { %v624_v56 = vsel %vm607_vm1, %v556_v48, 0.0  ;;  %v625_v35 = vsel %vm607_vm1, %v557_v49, 0.0  ;;  %v2630_v59 = vpop.f32.mrb[6].mxu1  ;;  %v2372_v61 = vpack.c.bf16 %v2016_v28, %v2015_v26  ;;  %v2377_v39 = vpack.c.bf16 %v2018_v34, %v2017_v44  ;;  %v897_v49 = vpop.xlane.xlu1 %896 }
 0x1c5   :  { %v640_v2 = vmul.f32 %v624_v56, %v624_v56  ;;  %v641_v5 = vmul.f32 %v625_v35, %v625_v35  ;;  %v730_v6 = vmul.f32 %v624_v56, %v3629_v29  ;;  %v731_v7 = vmul.f32 %v625_v35, %v3631_v30  ;;  %v439_v8 = vpop.f32.mrb[7].mxu1  ;;  %2401 = vst [vmem:[#allocation21 + $0x20] sm:$0xff] %v2367_v57  }
 0x1c6   :  { %v2010_v29 = vmul.f32 0.0, %v3722_v47  ;;  %v2011_v30 = vmul.f32 0.0, %v3726_v53  ;;  %v1502_v47 = vld [vmem:[#allocation15 + $0x78] sm:$0xff]  ;;  %2402 = vst [vmem:[#allocation21 + $0x28] sm:$0xff] %v2372_v61   ;;  %2403 = vst [vmem:[#allocation21 + $0x30] sm:$0xff] %v2377_v39   ;;  %v893_v48 = vpop.xlane.xlu0 %892 }
 0x1c7   :  { %v656_v15 = vadd.f32 %v641_v5, %v640_v2  ;;  %v2267_v38 = vpack.c.bf16 %v731_v7, %v730_v6  ;;  %2823 = vmatmul.mubr.f32.gmra.mrb[46].mxu1 %v1502_v47  ;;  %2404 = vst [vmem:[#allocation21 + $0x38] sm:$0xff] %v2382_v10  }
 0x1c8   :  { %v2633_v43 = vpop.f32.mrb[8].mxu1  ;;  %v2357_v0 = vpack.c.bf16 %v2010_v29, %v2009_v60  ;;  %v2362_v40 = vpack.c.bf16 %v2012_v12, %v2011_v30 }
 0x1c9   :  { %671 = vadd.xlane.f32.xlu0 %v656_v15  ;;  %2268 = vst [vmem:[#allocation18] sm:$0xff] %v2267_v38   ;;  %v449_v20 = vpop.f32.mrb[9].mxu1 }
 0x1ca   :  { %2399 = vst [vmem:[#allocation21 + $0x10] sm:$0xff] %v2357_v0   ;;  %2400 = vst [vmem:[#allocation21 + $0x18] sm:$0xff] %v2362_v40   ;;  %v895_v52 = vpop.xlane.xlu0 %894 }
 0x1cc   :  { %v2636_v53 = vpop.f32.mrb[10].mxu1 }
 0x1cd   :  { %v459_v42 = vpop.f32.mrb[11].mxu1 }
 0x1d0   :  { %v2639_v50 = vpop.f32.mrb[12].mxu1 }
 0x1d1   :  { %v469_v23 = vpop.f32.mrb[13].mxu1 }
 0x1d4   :  { %v2642_v33 = vpop.f32.mrb[14].mxu1 }
 0x1d5   :  { %v479_v45 = vpop.f32.mrb[15].mxu1 }
 0x1f8   :  { %v2712_v51 = vpop.f32.mrb[16].mxu1 }
 0x1f9   :  { %v1004_v55 = vpop.f32.mrb[2].mxu0  ;;  %v1074_v56 = vpop.f32.mrb[17].mxu1  ;;  %v1174_v62 = vmul.f32 2.0, %v2712_v51 }
 0x1fa   :  { %v1156_v35 = vrot.slane %v1004_v55, %v3732_v58  ;;  %v2677_v59 = vpop.f32.mrb[3].mxu0  ;;  %v1173_v63 = vmul.f32 2.0, %v1074_v56  ;;  %v1538_v51 = vpop.xlane.xlu1 %1537 }
 0x1fc   :  { %v1158_v2 = vadd.f32 %v1156_v35, %v893_v48  ;;  %v1157_v5 = vadd.f32 %v1156_v35, %v891_v46  ;;  %v1159_v6 = vadd.f32 %v1156_v35, %v895_v52  ;;  %v2715_v7 = vpop.f32.mrb[18].mxu1  ;;  %v1160_v8 = vadd.f32 %v1156_v35, %v897_v49  ;;  %v1536_v52 = vpop.xlane.xlu0 %1535 }
 0x1fd   :  { %v1176_v9 = vmul.f32 2.0, %v2715_v7  ;;  %v1084_v13 = vpop.f32.mrb[19].mxu1 }
 0x1fe   :  { %v1190_v14 = vsub.f32 %v1158_v2, %v1174_v62  ;;  %v1189_v32 = vsub.f32 %v1157_v5, %v1173_v63  ;;  %v1175_v15 = vmul.f32 2.0, %v1084_v13  ;;  %v1542_v55 = vpop.xlane.xlu1 %1541 }
 0x1ff   :  { %v1192_v38 = vsub.f32 %v1160_v8, %v1176_v9 }
 0x200   :  { %v1206_v43 = vsub.f32 1.0, %v1190_v14  ;;  %v1205_v19 = vsub.f32 1.0, %v1189_v32  ;;  %v1191_v54 = vsub.f32 %v1159_v6, %v1175_v15  ;;  %v2718_v20 = vpop.f32.mrb[20].mxu1  ;;  %v1540_v2 = vpop.xlane.xlu0 %1539 }
 0x201   :  { %v1208_v60 = vsub.f32 1.0, %v1192_v38  ;;  %v1094_v29 = vpop.f32.mrb[21].mxu1 }
 0x202   :  { %v1222_v30 = vmax.f32 %v1206_v43, 0.0  ;;  %v1221_v4 = vmax.f32 %v1205_v19, 0.0  ;;  %v1207_v12 = vsub.f32 1.0, %v1191_v54 }
 0x203   :  { %v1224_v21 = vmax.f32 %v1208_v60, 0.0 }
 0x204   :  { %v1269_v22 = vsel %vm607_vm1, %v1221_v4, 0.0  ;;  %v1270_v24 = vsel %vm607_vm1, %v1222_v30, 0.0  ;;  %v1223_v26 = vmax.f32 %v1207_v12, 0.0  ;;  %v2721_v25 = vpop.f32.mrb[22].mxu1 }
 0x205   :  { %v1285_v0 = vmul.f32 %v1269_v22, %v1269_v22  ;;  %v1375_v28 = vmul.f32 %v1269_v22, %v3686_v27  ;;  %v1376_v44 = vmul.f32 %v1270_v24, %v3688_v17  ;;  %v1272_v34 = vsel %vm607_vm1, %v1224_v21, 0.0  ;;  %v1104_v47 = vpop.f32.mrb[23].mxu1 }
 0x206   :  { %v1271_v53 = vsel %vm607_vm1, %v1223_v26, 0.0  ;;  %v1286_v37 = vmul.f32 %v1270_v24, %v1270_v24  ;;  %v1378_v11 = vmul.f32 %v1272_v34, %v3698_v18  ;;  %v1288_v17 = vmul.f32 %v1272_v34, %v1272_v34 }
 0x207   :  { %v2307_v40 = vpack.c.bf16 %v1376_v44, %v1375_v28  ;;  %v1377_v57 = vmul.f32 %v1271_v53, %v3694_v31  ;;  %v1287_v42 = vmul.f32 %v1271_v53, %v1271_v53 }
 0x208   :  { %v1301_v61 = vadd.f32 %v1286_v37, %v1285_v0  ;;  %v2724_v39 = vpop.f32.mrb[24].mxu1 }
 0x209   :  { %2308 = vst [vmem:[#allocation19] sm:$0xff] %v2307_v40   ;;  %v2312_v27 = vpack.c.bf16 %v1378_v11, %v1377_v57  ;;  %v1114_v10 = vpop.f32.mrb[25].mxu1  ;;  %v717_v57 = vpop.xlane.xlu1 %716 }
 0x20a   :  { %v1302_v50 = vadd.f32 %v1301_v61, %v1287_v42 }
 0x20b   :  { %2391 = vst [vmem:[#allocation19 + $0x8] sm:$0xff] %v2312_v27  }
 0x20c   :  { %v1303_v23 = vadd.f32 %v1302_v50, %v1288_v17  ;;  %v2727_v33 = vpop.f32.mrb[26].mxu1 }
 0x20d   :  { %v1124_v45 = vpop.f32.mrb[27].mxu1 }
 0x20e   :  { %1316 = vadd.xlane.f32.xlu0 %v1303_v23 }
 0x210   :  { %v2730_v46 = vpop.f32.mrb[28].mxu1 }
 0x211   :  { %v1134_v48 = vpop.f32.mrb[29].mxu1 }
 0x214   :  { %v2733_v49 = vpop.f32.mrb[30].mxu1 }
 0x215   :  { %v1144_v18 = vpop.f32.mrb[31].mxu1 }
 0x216   :  { %v1362_v18 = vpop.xlane.xlu1 %1361 }
 0x238   :  { %v2803_v31 = vpop.f32.mrb[32].mxu1 }
 0x239   :  { %v1649_v56 = vpop.f32.mrb[4].mxu0  ;;  %v1719_v35 = vpop.f32.mrb[33].mxu1  ;;  %v1819_v63 = vmul.f32 2.0, %v2803_v31 }
 0x23a   :  { %v1801_v59 = vrot.slane %v1649_v56, %v3732_v58  ;;  %v2768_v62 = vpop.f32.mrb[5].mxu0  ;;  %v1818_v7 = vmul.f32 2.0, %v1719_v35 }
 0x23c   :  { %v1803_v5 = vadd.f32 %v1801_v59, %v1538_v51  ;;  %v1802_v6 = vadd.f32 %v1801_v59, %v1536_v52  ;;  %v1805_v8 = vadd.f32 %v1801_v59, %v1542_v55  ;;  %v2806_v9 = vpop.f32.mrb[34].mxu1  ;;  %v1804_v38 = vadd.f32 %v1801_v59, %v1540_v2 }
 0x23d   :  { %v1821_v13 = vmul.f32 2.0, %v2806_v9  ;;  %v1729_v14 = vpop.f32.mrb[35].mxu1  ;;  %v1363_v52 = vrot.slane %v1362_v18, 4 }
 0x23e   :  { %v1835_v32 = vsub.f32 %v1803_v5, %v1819_v63  ;;  %v1834_v15 = vsub.f32 %v1802_v6, %v1818_v7  ;;  %v1820_v43 = vmul.f32 2.0, %v1729_v14 }
 0x23f   :  { %v1837_v19 = vsub.f32 %v1805_v8, %v1821_v13  ;;  %v1364_v56 = vadd.f32 %v1363_v52, %v1362_v18 }
 0x240   :  { %v1851_v54 = vsub.f32 1.0, %v1835_v32  ;;  %v1850_v20 = vsub.f32 1.0, %v1834_v15  ;;  %v1836_v60 = vsub.f32 %v1804_v38, %v1820_v43 }
 0x241   :  { %v1853_v58 = vsub.f32 1.0, %v1837_v19  ;;  %v1365_v62 = vrot.slane %v1364_v56, 2 }
 0x242   :  { %v1867_v29 = vmax.f32 %v1851_v54, 0.0  ;;  %v1866_v30 = vmax.f32 %v1850_v20, 0.0  ;;  %v1852_v4 = vsub.f32 1.0, %v1836_v60 }
 0x243   :  { %v1869_v12 = vmax.f32 %v1853_v58, 0.0  ;;  %v1366_v7 = vadd.f32 %v1365_v62, %v1364_v56 }
 0x244   :  { %v1899_v21 = vsel %vm1882_vm2, %v1866_v30, 0.0  ;;  %v1900_v22 = vsel %vm1882_vm2, %v1867_v29, 0.0  ;;  %v1868_v24 = vmax.f32 %v1852_v4, 0.0 }
 0x245   :  { %v1915_v26 = vmul.f32 %v1899_v21, %v1899_v21  ;;  %v2005_v25 = vmul.f32 %v1899_v21, %v3702_v3  ;;  %v2006_v0 = vmul.f32 %v1900_v22, %v3704_v41  ;;  %v1902_v28 = vsel %vm1882_vm2, %v1869_v12, 0.0 }
 0x246   :  { %v1901_v44 = vsel %vm1882_vm2, %v1868_v24, 0.0  ;;  %v1916_v34 = vmul.f32 %v1900_v22, %v1900_v22  ;;  %v2008_v47 = vmul.f32 %v1902_v28, %v3714_v1  ;;  %v1918_v42 = vmul.f32 %v1902_v28, %v1902_v28 }
 0x247   :  { %v2347_v53 = vpack.c.bf16 %v2006_v0, %v2005_v25  ;;  %v2007_v16 = vmul.f32 %v1901_v44, %v3710_v36  ;;  %v1917_v37 = vmul.f32 %v1901_v44, %v1901_v44  ;;  %v718_v3 = vrot.slane %v717_v57, 4 }
 0x248   :  { %v1931_v11 = vadd.f32 %v1916_v34, %v1915_v26  ;;  %v1367_v32 = vrot.slane %v1366_v7, 1 }
 0x249   :  { %2348 = vst [vmem:[#allocation21] sm:$0xff] %v2347_v53   ;;  %v2352_v40 = vpack.c.bf16 %v2008_v47, %v2007_v16  ;;  %v719_v41 = vadd.f32 %v718_v3, %v717_v57 }
 0x24a   :  { %v1932_v61 = vadd.f32 %v1931_v11, %v1917_v37 }
 0x24b   :  { %2398 = vst [vmem:[#allocation21 + $0x8] sm:$0xff] %v2352_v40   ;;  %v720_v27 = vrot.slane %v719_v41, 2 }
 0x24c   :  { %v1933_v39 = vadd.f32 %v1932_v61, %v1918_v42 }
 0x24d   :  { %v721_v50 = vadd.f32 %v720_v27, %v719_v41 }
 0x24e   :  { %1946 = vadd.xlane.f32.xlu0 %v1933_v39 }
 0x24f   :  { %v722_v33 = vrot.slane %v721_v50, 1 }
 0x251   :  { %v723_v46 = vadd.f32 %v722_v33, %v721_v50 }
 0x254   :  { %v2809_v49 = vpop.f32.mrb[36].mxu1 }
 0x255   :  { %v1739_v51 = vpop.f32.mrb[37].mxu1 }
 0x256   :  { %v672_v10 = vpop.xlane.xlu0 %671 }
 0x257   :  { %v673_v17 = vrot.slane %v672_v10, 4 }
 0x259   :  { %v674_v1 = vadd.f32 %v673_v17, %v672_v10  ;;  %v2812_v31 = vpop.f32.mrb[38].mxu1 }
 0x25a   :  { %v1749_v55 = vpop.f32.mrb[39].mxu1 }
 0x25b   :  { %v675_v23 = vrot.slane %v674_v1, 2 }
 0x25d   :  { %v676_v36 = vadd.f32 %v675_v23, %v674_v1  ;;  %v2815_v35 = vpop.f32.mrb[40].mxu1 }
 0x25e   :  { %v1759_v59 = vpop.f32.mrb[41].mxu1 }
 0x25f   :  { %v677_v45 = vrot.slane %v676_v36, 1 }
 0x261   :  { %v678_v48 = vadd.f32 %v677_v45, %v676_v36 }
 0x263   :  { %2993 = vpush %v678_v48 }
 0x264   :  { %2995 = vpush %v723_v46 }
 0x28e   :  { %v2818_v63 = vpop.f32.mrb[42].mxu1 }
 0x28f   :  { %v1769_v2 = vpop.f32.mrb[43].mxu1 }
 0x293   :  { %v2821_v8 = vpop.f32.mrb[44].mxu1 }
 0x294   :  { %v1779_v13 = vpop.f32.mrb[45].mxu1 }
 0x29a   :  { %v2824_v15 = vpop.f32.mrb[46].mxu1 }
 0x29b   :  { %v1317_v5 = vpop.xlane.xlu0 %1316  ;;  %v1789_v43 = vpop.f32.mrb[47].mxu1 }
 0x29c   :  { %v1318_v6 = vrot.slane %v1317_v5, 4 }
 0x29e   :  { %v1319_v9 = vadd.f32 %v1318_v6, %v1317_v5 }
 0x2a0   :  { %v1320_v14 = vrot.slane %v1319_v9, 2 }
 0x2a2   :  { %v1321_v38 = vadd.f32 %v1320_v14, %v1319_v9 }
 0x2a4   :  { %v1322_v19 = vrot.slane %v1321_v38, 1 }
 0x2a5   :  { %3235 = shalt.err (!%p3232_p6)
}
 0x2a6   :  { %s3236_s5 = scalar_lea.hbm %s3858_s10, 1024 }
 0x2a7   :  { %p3237_p7 = scmp.ne.s32.totalorder %s3858_s10, %s3236_s5  ;;  %p3240_p8 = scmp.lt.u32.totalorder %s3236_s5, %s3858_s10 }
 0x2a9   :  { %p3242_p9 = pnand %p3240_p8, %p3237_p7 }
 0x2ab   :  { %3245 = shalt.err (!%p3242_p9)
}
 0x2ac   :  { %s3333_s20 = smov 64   ;;  %s3334_s4 = smov 4   ;;  %v1368_v54 = vadd.f32 %v1367_v32, %v1366_v7 }
 0x2ad   :  { %2126 = dma.vmem_to_hbm [thread:$0]  %s2121_s15, 1024, %s3858_s10, [#allocation20], %s3333_s20, %s3333_s20, %s3334_s4  }
 0x2ae   :  { %s3246_s24 = scalar_lea.vmem %s3784_s23, 1024  ;;  %p3251_p11 = scmp.lt.s32.totalorder %s3784_s23, %s3784_s23 }
 0x2af   :  { %p3247_p10 = scmp.ne.s32.totalorder %s3784_s23, %s3246_s24  ;;  %p3252_p12 = scmp.lt.s32.totalorder %s3246_s24, %s3246_s24 }
 0x2b1   :  { %p3253_p13 = por %p3252_p12, %p3251_p11 }
 0x2b3   :  { %p3254_p0 = pnand %p3253_p13, %p3247_p10 }
 0x2b5   :  { %3257 = shalt.err (!%p3254_p0)
}
 0x2b6   :  { %s3258_s1 = scalar_lea.hbm %s3857_s9, 1024 }
 0x2b7   :  { %p3259_p1 = scmp.ne.s32.totalorder %s3857_s9, %s3258_s1  ;;  %p3262_p2 = scmp.lt.u32.totalorder %s3258_s1, %s3857_s9 }
 0x2b9   :  { %p3264_p3 = pnand %p3262_p2, %p3259_p1 }
 0x2bb   :  { %3267 = shalt.err (!%p3264_p3)
}
 0x2bc   :  { %2114 = dma.vmem_to_hbm [thread:$0]  %s3784_s23, 1024, %s3857_s9, [#allocation4], %s3333_s20, %s3333_s20, %s3334_s4   ;;  %v1323_v20 = vadd.f32 %v1322_v19, %v1321_v38 }
 0x2bd   :  { %s3335_s6 = smov [#allocation21]  }
 0x2be   :  { %s2132_s26 = sshll.u32 %s3335_s6, 4  ;;  %2997 = vpush %v1323_v20  ;;  %s2133_s26 = int_to_ptr.vmem [resolvable:$true] %s2132_s26 }
 0x2bf   :  { %2999 = vpush %v1368_v54  ;;  %s3268_s8 = scalar_lea.vmem %s2133_s26, 1024  ;;  %p3273_p5 = scmp.lt.s32.totalorder %s2133_s26, %s2133_s26 }
 0x2c0   :  { %p3269_p4 = scmp.ne.s32.totalorder %s2133_s26, %s3268_s8  ;;  %p3274_p6 = scmp.lt.s32.totalorder %s3268_s8, %s3268_s8 }
 0x2c2   :  { %p3275_p7 = por %p3274_p6, %p3273_p5 }
 0x2c4   :  { %p3276_p8 = pnand %p3275_p7, %p3269_p4 }
 0x2c6   :  { %3279 = shalt.err (!%p3276_p8)
}
 0x2c7   :  { %s3280_s13 = scalar_lea.hbm %s3859_s11, 1024 }
 0x2c8   :  { %p3281_p9 = scmp.ne.s32.totalorder %s3859_s11, %s3280_s13  ;;  %p3284_p10 = scmp.lt.u32.totalorder %s3280_s13, %s3859_s11 }
 0x2ca   :  { %p3286_p11 = pnand %p3284_p10, %p3281_p9 }
 0x2cc   :  { %3289 = shalt.err (!%p3286_p11)
}
 0x2cd   :  { %2138 = dma.vmem_to_hbm [thread:$0]  %s2133_s26, 1024, %s3859_s11, [#allocation20], %s3333_s20, %s3333_s20, %s3334_s4   ;;  %v1992_v60 = vpop.xlane.xlu1 %1991 }
 0x2ce   :  { %v1993_v58 = vrot.slane %v1992_v60, 4  ;;  %s2994_s19 = spop %2993  ;;  %s3290_s18 = scalar_lea.hbm %s3860_s12, 16 }
 0x2cf   :  { %s2996_s21 = spop %2995  ;;  %s682_s0 = smul.f32 0.001953125, %s2994_s19 }
 0x2d0   :  { %v1994_v29 = vadd.f32 %v1993_v58, %v1992_v60  ;;  %s727_s20 = smul.f32 0.001953125, %s2996_s21  ;;  %p3291_p12 = scmp.ne.s32.totalorder %s3860_s12, %s3290_s18 }
 0x2d1   :  { %s683_s3 = smul.f32 0.006, %s682_s0  ;;  %p3294_p13 = scmp.lt.u32.totalorder %s3290_s18, %s3860_s12 }
 0x2d2   :  { %v1995_v30 = vrot.slane %v1994_v29, 2  ;;  %s728_s24 = smul.f32 20.0, %s727_s20 }
 0x2d3   :  { %p3296_p0 = pnand %p3294_p13, %p3291_p12 }
 0x2d4   :  { %v1996_v22 = vadd.f32 %v1995_v30, %v1994_v29  ;;  %s729_s1 = sadd.f32 %s728_s24, %s683_s3 }
 0x2d6   :  { %v1997_v25 = vrot.slane %v1996_v22, 1 }
 0x2d8   :  { %v1998_v44 = vadd.f32 %v1997_v25, %v1996_v22 }
 0x2db   :  { %v1947_v4 = vpop.xlane.xlu0 %1946 }
 0x2dc   :  { %v1948_v12 = vrot.slane %v1947_v4, 4 }
 0x2de   :  { %v1949_v21 = vadd.f32 %v1948_v12, %v1947_v4 }
 0x2e0   :  { %v1950_v24 = vrot.slane %v1949_v21, 2 }
 0x2e2   :  { %v1951_v26 = vadd.f32 %v1950_v24, %v1949_v21 }
 0x2e4   :  { %v1952_v0 = vrot.slane %v1951_v26, 1 }
 0x2e6   :  { %v1953_v28 = vadd.f32 %v1952_v0, %v1951_v26 }
 0x2e8   :  { %3001 = vpush %v1953_v28 }
 0x2e9   :  { %3003 = vpush %v1998_v44 }
 0x2ef   :  { %s2998_s11 = spop %2997 }
 0x2f0   :  { %s1327_s4 = smul.f32 0.0009765625, %s2998_s11  ;;  %s3000_s25 = spop %2999 }
 0x2f1   :  { %s1372_s27 = smul.f32 0.0009765625, %s3000_s25 }
 0x2f2   :  { %s1328_s28 = smul.f32 0.006, %s1327_s4 }
 0x2f3   :  { %s1373_s14 = smul.f32 20.0, %s1372_s27 }
 0x2f4   :  { %s1329_s7 = sadd.f32 %s1328_s28, %s729_s1 }
 0x2f6   :  { %s1374_s6 = sadd.f32 %s1373_s14, %s1329_s7 }
 0x319   :  { %s3002_s22 = spop %3001 }
 0x31a   :  { %s1957_s29 = smul.f32 0.001953125, %s3002_s22  ;;  %s3004_s10 = spop %3003 }
 0x31b   :  { %s2002_s2 = smul.f32 0.001953125, %s3004_s10 }
 0x31c   :  { %s1958_s26 = smul.f32 0.006, %s1957_s29 }
 0x31d   :  { %s2003_s15 = smul.f32 20.0, %s2002_s2 }
 0x31e   :  { %s1959_s8 = sadd.f32 %s1958_s26, %s1374_s6 }
 0x320   :  { %s2004_s16 = sadd.f32 %s2003_s15, %s1959_s8 }
 0x322   :  { %2102 = sst [smem:[#allocation22]] %s2004_s16 }
 0x323   :  { %3299 = shalt.err (!%p3296_p0)
}
 0x324   :  { %s3336_s19 = smov [#allocation22]  }
 0x325   :  { %2146 = dma.smem_to_hbm %s3336_s19, 16, %s3860_s12, [#allocation5]  }
 0x326   :  { %3310 = dma.done.wait [#allocation4], 1024  }
 0x327   :  { %3311 = vsyncadd [#allocation4], 4294966272 }
 0x328   :  { %3312 = dma.done.wait [#allocation20], 2048  }
 0x329   :  { %3313 = vsyncadd [#allocation20], 4294965248 }
 0x32a   :  { %3314 = dma.done.wait [#allocation5], 16  }
 0x32b   :  { %3315 = vsyncadd [#allocation5], 4294967280 }
 0x32c   :  { %2159 = sfence }
 0x32d   :  { %2160 = vsyncpa [#allocation3], 1 }
 0x32e   :  { %2161 = vsyncpa [#allocation7], 1 }
 0x32f   :  { %2162 = vsyncpa [#allocation10], 1 }
 0x330   :  { %2163 = vsyncpa [#allocation13], 1 }
 0x331   :  { %2164 = vsyncpa [#allocation16], 1 }
 0x332   :  { %2165 = vsyncpa [#allocation4], 1 }
 0x333   :  { %2166 = vsyncpa [#allocation20], 1 }
 0x334   :  { %2167 = vsyncpa [#allocation5], 1 }

</bundles_post_ra>
